<compile_context>
chip_gen: v5e
topology: v5e:2x2
jax: 0.10.0
libtpu: 0.0.40
codegen_flags: <defaults>
</compile_context>

<pallas_src>
import math

import jax
import jax.numpy as jnp
from jax.experimental import pallas as pl
from jax.experimental.pallas import tpu as pltpu

FP = 128   # padded feature / lane width


# ----------------------------------------------------------------------------- #
# helpers
# ----------------------------------------------------------------------------- #

def _round_up(x, m):
    return ((x + m - 1) // m) * m


def _pad2(a, rows, cols):
    return jnp.pad(a, ((0, rows - a.shape[0]), (0, cols - a.shape[1])))


def _pick_tile(n, target, prefer_multi_step=True):
    """Largest multiple-of-8 divisor of n that is <= target; for 'parallel' grid
    axes prefer a tile that gives >= 2 steps (v7x megacore needs >= 2)."""
    best = 8
    for t in range(8, min(n, target) + 1, 8):
        if n % t == 0:
            best = t
    if prefer_multi_step and n // best < 2:
        for t in range(best - 8, 7, -8):
            if n % t == 0 and n // t >= 2:
                return t
    return best


def _vmem_limit_bytes():
    """Scoped-VMEM budget from the actual chip (v5e/v6e: 128 MiB phys, v7x: 64 MiB);
    conservative fallback if the query is unavailable."""
    cap = 64 * 1024 * 1024
    try:
        cap = int(getattr(pltpu.get_tpu_info(), "vmem_capacity_bytes", cap))
    except Exception:
        pass
    return max(32 * 1024 * 1024, min(cap - 16 * 1024 * 1024, 100 * 1024 * 1024))


_VMEM_LIMIT = _vmem_limit_bytes()


def _leaky_relu(x):
    return jnp.where(x >= 0, x, 0.01 * x)


_SELU_ALPHA = 1.6732632423543772
_SELU_SCALE = 1.0507009873554805


def _selu(x):
    return _SELU_SCALE * jnp.where(x > 0, x, _SELU_ALPHA * (jnp.exp(x) - 1.0))


# ----------------------------------------------------------------------------- #
# Pallas kernels
# ----------------------------------------------------------------------------- #

def _node_embed_kernel(x_ref, w1_ref, b1_ref, w2_ref, b2_ref, o_ref):
    # NodeEmbedding (one node-type row tile): x -> Linear -> Linear -> LeakyReLU
    h = jnp.dot(x_ref[0], w1_ref[0], preferred_element_type=jnp.float32) + b1_ref[0]
    h = jnp.dot(h.astype(jnp.bfloat16), w2_ref[0],
                preferred_element_type=jnp.float32) + b2_ref[0]
    o_ref[0] = _leaky_relu(h).astype(o_ref.dtype)


def node_embedding_fused(x_stack, w1t, b1, w2t, b2):
    n_types, npad, fp = x_stack.shape
    tr = _pick_tile(npad, 512)
    return pl.pallas_call(
        _node_embed_kernel,
        out_shape=jax.ShapeDtypeStruct((n_types, npad, fp), jnp.bfloat16),
        grid=(n_types, npad // tr),
        in_specs=[
            pl.BlockSpec((1, tr, fp), lambda t, r: (t, r, 0)),
            pl.BlockSpec((1, fp, fp), lambda t, r: (t, 0, 0)),
            pl.BlockSpec((1, 1, fp), lambda t, r: (t, 0, 0)),
            pl.BlockSpec((1, fp, fp), lambda t, r: (t, 0, 0)),
            pl.BlockSpec((1, 1, fp), lambda t, r: (t, 0, 0)),
        ],
        out_specs=pl.BlockSpec((1, tr, fp), lambda t, r: (t, r, 0)),
        compiler_params=pltpu.CompilerParams(
            dimension_semantics=("parallel", "parallel"),
            vmem_limit_bytes=_VMEM_LIMIT),
    )(x_stack, w1t, b1, w2t, b2)


def _conv_tiles(npad):
    tm = _pick_tile(npad, 512)                              # dst-row tile ("parallel")
    tk = _pick_tile(npad, 1024, prefer_multi_step=False)    # contraction (src) tile
    return tm, tk


def _hetero_conv_kernel(si_ref, di_ref, first_ref, last_ref, kt_ref,
                        a_ref, hsrc_ref, hdst_ref, invdeg_ref, w_ref,
                        o_ref, agg_ref, acc_ref):
    # One HeteroGraphConv layer (aggregation='mean', aggregate='sum'):
    #   agg = (1/deg) * sum_k A_indicator[r, k] @ h_src[k]      (f32 accumulator)
    #   z   = relu([h_dst, agg] @ [Wself; Wneigh])              (one K=256 MXU dot)
    #   z   = z / ||z||_2   (rows with zero norm untouched)
    #   out[dst] = sum of z over the (consecutive) etypes targeting dst
    e = pl.program_id(1)
    k = pl.program_id(2)
    nk = pl.num_programs(2)

    @pl.when(k == 0)
    def _():
        agg_ref[...] = jnp.zeros_like(agg_ref)

    @pl.when(jnp.logical_and(first_ref[e] == 1, k == 0))
    def _():
        acc_ref[...] = jnp.zeros_like(acc_ref)

    @pl.when(k < kt_ref[e])                 # skip all-zero (padding) source tiles
    def _():
        agg_ref[...] += jnp.dot(a_ref[0], hsrc_ref[0],
                                preferred_element_type=jnp.float32)

    @pl.when(k == nk - 1)
    def _():
        agg = (agg_ref[...] * invdeg_ref[0]).astype(jnp.bfloat16)   # f32 1/deg scaling
        xin = jnp.concatenate([hdst_ref[0], agg], axis=1)           # (tm, 2*FP)
        z = jnp.dot(xin, w_ref[e], preferred_element_type=jnp.float32)
        z = jnp.maximum(z, 0.0)
        ssq = jnp.sum(z * z, axis=1, keepdims=True)
        inv = jnp.where(ssq > 0.0, jax.lax.rsqrt(ssq), 1.0)         # rsqrt -> EUP
        acc_ref[...] += z * inv

    @pl.when(jnp.logical_and(last_ref[e] == 1, k == nk - 1))
    def _():
        o_ref[0] = acc_ref[...].astype(o_ref.dtype)


def hetero_conv_fused(adj_stack, invdeg_stack, h_stack, w_fused, meta):
    src_idx, dst_idx, first, last, ktiles = meta
    n_e, npad, _ = adj_stack.shape
    n_types, _, fp = h_stack.shape
    tm, tk = _conv_tiles(npad)
    grid = (npad // tm, n_e, npad // tk)

    def a_map(r, e, k, si, di, fi, la, kt):
        return (e, r, jnp.minimum(k, kt[e] - 1))

    def hsrc_map(r, e, k, si, di, fi, la, kt):
        return (si[e], jnp.minimum(k, kt[e] - 1), 0)

    def hdst_map(r, e, k, si, di, fi, la, kt):
        return (di[e], r, 0)

    def invdeg_map(r, e, k, si, di, fi, la, kt):
        return (e, r, 0)

    def w_map(r, e, k, si, di, fi, la, kt):
        return (0, 0, 0)

    def out_map(r, e, k, si, di, fi, la, kt):
        return (di[e], r, 0)

    return pl.pallas_call(
        _hetero_conv_kernel,
        out_shape=jax.ShapeDtypeStruct((n_types, npad, fp), jnp.bfloat16),
        grid_spec=pltpu.PrefetchScalarGridSpec(
            num_scalar_prefetch=5,
            grid=grid,
            in_specs=[
                pl.BlockSpec((1, tm, tk), a_map),          # 0/1 adjacency tile (bf16)
                pl.BlockSpec((1, tk, fp), hsrc_map),       # h_src contraction tile
                pl.BlockSpec((1, tm, fp), hdst_map),       # h_dst row tile
                pl.BlockSpec((1, tm, 1), invdeg_map),      # 1/deg (f32)
                pl.BlockSpec((n_e, 2 * fp, fp), w_map),    # resident [Wself;Wneigh]
            ],
            out_specs=pl.BlockSpec((1, tm, fp), out_map),
            scratch_shapes=[pltpu.VMEM((tm, fp), jnp.float32),    # neighbor-sum acc
                            pltpu.VMEM((tm, fp), jnp.float32)],   # per-dst etype sum
        ),
        compiler_params=pltpu.CompilerParams(
            dimension_semantics=("parallel", "arbitrary", "arbitrary"),
            vmem_limit_bytes=_VMEM_LIMIT),
    )(src_idx, dst_idx, first, last, ktiles,
      adj_stack, h_stack, h_stack, invdeg_stack, w_fused)


def _pred_mlp_kernel(hs_ref, ht_ref, w1_ref, b1_ref, w2_ref, b2_ref,
                     w3_ref, b3_ref, o_ref):
    # PredictionLayer on batched (pos+neg, both etypes) edges.  The [h_src, h_dst]
    # concat is done in-kernel against the stacked (2*FP, FP) W1: one K=256 dot.
    x = jnp.concatenate([hs_ref[...], ht_ref[...]], axis=1)
    h = jnp.dot(x, w1_ref[...], preferred_element_type=jnp.float32) + b1_ref[...]
    h = _selu(h)
    h = _selu(jnp.dot(h.astype(jnp.bfloat16), w2_ref[...],
                      preferred_element_type=jnp.float32) + b2_ref[...])
    o_ref[...] = (jnp.dot(h.astype(jnp.bfloat16), w3_ref[...],
                          preferred_element_type=jnp.float32) + b3_ref[...]
                  ).astype(o_ref.dtype)


def prediction_mlp_fused(heads, tails, pp):
    e_pad, fp = heads.shape
    tme = _pick_tile(e_pad, 512)
    full = lambda i: (0, 0)
    return pl.pallas_call(
        _pred_mlp_kernel,
        out_shape=jax.ShapeDtypeStruct((e_pad, fp), jnp.float32),
        grid=(e_pad // tme,),
        in_specs=[
            pl.BlockSpec((tme, fp), lambda i: (i, 0)),
            pl.BlockSpec((tme, fp), lambda i: (i, 0)),
            pl.BlockSpec((2 * fp, fp), full),
            pl.BlockSpec((1, fp), full),
            pl.BlockSpec((fp, fp), full),
            pl.BlockSpec((1, fp), full),
            pl.BlockSpec((fp, fp), full),
            pl.BlockSpec((1, fp), full),
        ],
        out_specs=pl.BlockSpec((tme, fp), lambda i: (i, 0)),
        compiler_params=pltpu.CompilerParams(
            dimension_semantics=("parallel",),
            vmem_limit_bytes=_VMEM_LIMIT),
    )(heads, tails, pp["w1_t"], pp["b1"], pp["w2t"], pp["b2"], pp["w3t"], pp["b3"])


# ----------------------------------------------------------------------------- #
# parameter init (deterministic, mirrors the torch module's shapes / gains)
# ----------------------------------------------------------------------------- #

def _xavier(key, out_f, in_f, gain=1.0):
    a = gain * math.sqrt(6.0 / (in_f + out_f))
    return jax.random.uniform(key, (out_f, in_f), jnp.float32, -a, a)


def _bias(key, in_f, out_f):
    bound = 1.0 / math.sqrt(in_f)
    return jax.random.uniform(key, (out_f,), jnp.float32, -bound, bound)


def init_params(key, dim_dict, etype_names, n_layers=2):
    keys = iter(jax.random.split(key, 256))
    relu_gain = math.sqrt(2.0)
    selu_gain = 0.75          # torch calculate_gain('selu')
    sigmoid_gain = 1.0

    def node_embd(in_f):
        return {
            "w1": _xavier(next(keys), dim_dict["out"], in_f),
            "b1": _bias(next(keys), in_f, dim_dict["out"]),
            "w2": _xavier(next(keys), dim_dict["hidden"], dim_dict["out"]),
            "b2": _bias(next(keys), dim_dict["out"], dim_dict["hidden"]),
        }

    params = {
        "embd": {
            "customer": node_embd(dim_dict["customer"]),
            "product": node_embd(dim_dict["product"]),
            "prod_group": node_embd(dim_dict["prod_group"]),
        },
        "layers": [],
        "pred": {
            "w1": _xavier(next(keys), 16, dim_dict["out"] * 2, selu_gain),
            "b1": _bias(next(keys), dim_dict["out"] * 2, 16),
            "w2": _xavier(next(keys), 8, 16, selu_gain),
            "b2": _bias(next(keys), 16, 8),
            "w3": _xavier(next(keys), 1, 8, sigmoid_gain),
            "b3": _bias(next(keys), 8, 1),
        },
    }

    layer_out_dims = [dim_dict["hidden"]] * (n_layers - 1) + [dim_dict["out"]]
    for out_d in layer_out_dims:
        layer = {}
        for ename in etype_names:
            layer[ename] = {
                "w_neigh": _xavier(next(keys), out_d, dim_dict["hidden"], relu_gain),
                "w_self": _xavier(next(keys), out_d, dim_dict["hidden"], relu_gain),
            }
        params["layers"].append(layer)
    return params


# ----------------------------------------------------------------------------- #
# parameter / graph preparation (padding, transposes, bf16 casts -- done once)
# ----------------------------------------------------------------------------- #

def _prep_w(w):
    # torch Linear weight [out, in] -> [in_pad, out_pad] bf16
    return _pad2(w.T, FP, FP).astype(jnp.bfloat16)


def _prep_b(b):
    return jnp.pad(b, (0, FP - b.shape[0])).reshape(1, FP).astype(jnp.float32)


def prepare_params(params, node_types, etype_order):
    embd = {"w1t": [], "b1": [], "w2t": [], "b2": []}
    for t in node_types:
        p = params["embd"][t]
        embd["w1t"].append(_prep_w(p["w1"]))
        embd["b1"].append(_prep_b(p["b1"]))
        embd["w2t"].append(_prep_w(p["w2"]))
        embd["b2"].append(_prep_b(p["b2"]))
    embd = {k: jnp.stack(v) for k, v in embd.items()}

    layers = []
    for lp in params["layers"]:
        # fused [Wself; Wneigh] -> (n_e, 2*FP, FP) bf16, kept VMEM-resident in-kernel
        w = jnp.stack([jnp.concatenate([_prep_w(lp[ename]["w_self"]),
                                        _prep_w(lp[ename]["w_neigh"])], axis=0)
                       for (_, ename, _) in etype_order])
        layers.append({"w_fused": w})

    p = params["pred"]
    half = p["w1"].shape[1] // 2
    w1 = jnp.concatenate([_pad2(p["w1"][:, :half].T, FP, FP),
                          _pad2(p["w1"][:, half:].T, FP, FP)],
                         axis=0).astype(jnp.bfloat16)            # (2*FP, FP)
    pred = {"w1_t": w1, "b1": _prep_b(p["b1"]),
            "w2t": _prep_w(p["w2"]), "b2": _prep_b(p["b2"]),
            "w3t": _prep_w(p["w3"]), "b3": _prep_b(p["b3"])}
    return {"embd": embd, "layers": layers, "pred": pred}


def build_adjacency(edges_src_dst, n_dst, n_src):
    """0/1 indicator adjacency (exact in bf16) + f32 inverse in-degree ('mean')."""
    src, dst = edges_src_dst
    a = jnp.zeros((n_dst, n_src), jnp.float32).at[dst, src].set(1.0)
    deg = jnp.sum(a, axis=1, keepdims=True)
    inv_deg = jnp.where(deg > 0.0, 1.0 / deg, 0.0)
    return a, inv_deg


def stack_block(adj_dict, etype_order, npad, type_index, n_real, tk):
    """Pad & stack per-etype indicators / inverse degrees + scalar-prefetch metadata."""
    a_stack, d_stack, src_idx, dst_idx, ktiles = [], [], [], [], []
    for (src, ename, dst) in etype_order:
        a, inv_deg = adj_dict[(src, ename, dst)]
        a_stack.append(_pad2(a, npad, npad))
        d_stack.append(_pad2(inv_deg, npad, 1))
        src_idx.append(type_index[src])
        dst_idx.append(type_index[dst])
        ktiles.append(max(1, -(-n_real[src] // tk)))      # real source tiles per etype
    n_e = len(etype_order)
    # the fused per-dst accumulation requires same-dst etypes to be consecutive
    for i in range(1, n_e):
        if dst_idx[i] != dst_idx[i - 1]:
            assert dst_idx[i] not in dst_idx[:i], \
                "etype_order must keep etypes with the same destination type consecutive"
    first = [1 if (i == 0 or dst_idx[i] != dst_idx[i - 1]) else 0 for i in range(n_e)]
    last = [1 if (i == n_e - 1 or dst_idx[i + 1] != dst_idx[i]) else 0 for i in range(n_e)]
    meta = (jnp.array(src_idx, jnp.int32), jnp.array(dst_idx, jnp.int32),
            jnp.array(first, jnp.int32), jnp.array(last, jnp.int32),
            jnp.array(ktiles, jnp.int32))
    return (jnp.stack(a_stack).astype(jnp.bfloat16),
            jnp.stack(d_stack).astype(jnp.float32), meta)


# ----------------------------------------------------------------------------- #
# fused forward (jitted)
# ----------------------------------------------------------------------------- #

@jax.jit
def gnn_forward(prep, x_stack, adj_stacks, invdeg_stacks, metas, head_idx, tail_idx):
    h = node_embedding_fused(x_stack, prep["embd"]["w1t"], prep["embd"]["b1"],
                             prep["embd"]["w2t"], prep["embd"]["b2"])
    for adj, invd, meta, lp in zip(adj_stacks, invdeg_stacks, metas, prep["layers"]):
        h = hetero_conv_fused(adj, invd, h, lp["w_fused"], meta)
    n_types, npad, fp = h.shape
    h_flat = h.reshape(n_types * npad, fp)
    # TODO(synk): edge-row gather stays as an XLA take (an in-kernel scalar-prefetch /
    #             manual-DMA gather is left out); the [h_src, h_dst] concat itself is
    #             fused into the prediction kernel via the stacked (2*FP, FP) W1.
    heads = jnp.take(h_flat, head_idx, axis=0)
    tails = jnp.take(h_flat, tail_idx, axis=0)
    scores = prediction_mlp_fused(heads, tails, prep["pred"])[:, 0]
    return h, scores


# ----------------------------------------------------------------------------- #
# pure-JAX f32 reference (unfused) for correctness checking
# ----------------------------------------------------------------------------- #

def reference_forward(params, h_in, blocks_adj, pos_graph_edges, neg_graph_edges):
    def embed(x, p):
        h = x @ p["w1"].T + p["b1"]
        return _leaky_relu(h @ p["w2"].T + p["b2"])

    h = {t: embed(h_in[t], params["embd"][t]) for t in h_in}
    for adj, lp in zip(blocks_adj, params["layers"]):
        out = {}
        for (src, ename, dst), (a, inv_deg) in adj.items():
            p = lp[ename]
            agg = (a * inv_deg) @ h[src]
            z = jnp.maximum(h[dst] @ p["w_self"].T + agg @ p["w_neigh"].T, 0.0)
            nrm = jnp.sqrt(jnp.sum(z * z, axis=1, keepdims=True))
            nrm = jnp.where(nrm == 0.0, 1.0, nrm)
            out[dst] = (z / nrm) if dst not in out else out[dst] + z / nrm
        h = out

    def pred(x):
        p = params["pred"]
        s = _selu(x @ p["w1"].T + p["b1"])
        s = _selu(s @ p["w2"].T + p["b2"])
        return s @ p["w3"].T + p["b3"]

    def score(graph_edges):
        d = {}
        for (src, ename, dst), (s_nid, d_nid) in graph_edges.items():
            if src in ("customer", "product") and dst in ("customer", "product"):
                cat = jnp.concatenate([h[src][s_nid], h[dst][d_nid]], axis=1)
                d[ename] = pred(cat).reshape(-1, 1)
        return d

    return h, score(pos_graph_edges), score(neg_graph_edges)


# ----------------------------------------------------------------------------- #
# demo
# ----------------------------------------------------------------------------- #

if __name__ == "__main__":
    key = jax.random.PRNGKey(0)

    # small shapes
    n_customer, n_product, n_group = 12, 10, 4
    dim_dict = {"customer": 6, "product": 5, "prod_group": 4, "hidden": 32, "out": 16}
    node_types = ["customer", "product", "prod_group"]
    type_index = {t: i for i, t in enumerate(node_types)}
    n_real = {"customer": n_customer, "product": n_product, "prod_group": n_group}

    # raw node features
    kf = jax.random.split(key, 4)
    h_in = {
        "customer": jax.random.normal(kf[0], (n_customer, dim_dict["customer"]), jnp.float32),
        "product": jax.random.normal(kf[1], (n_product, dim_dict["product"]), jnp.float32),
        "prod_group": jax.random.normal(kf[2], (n_group, dim_dict["prod_group"]), jnp.float32),
    }

    # message-passing graph (deterministic edges), canonical etypes
    c = jnp.arange(n_customer)
    buys_src = jnp.concatenate([c, c])
    buys_dst = jnp.concatenate([c % n_product, (2 * c + 3) % n_product])
    p = jnp.arange(n_product)
    grp_src, grp_dst = p, p % n_group

    adj_graph = {
        ("customer", "buys", "product"): build_adjacency((buys_src, buys_dst), n_product, n_customer),
        ("product", "rev_buys", "customer"): build_adjacency((buys_dst, buys_src), n_customer, n_product),
        ("product", "groups", "prod_group"): build_adjacency((grp_src, grp_dst), n_group, n_product),
        ("prod_group", "rev_groups", "product"): build_adjacency((grp_dst, grp_src), n_product, n_group),
    }
    canonical = list(adj_graph.keys())
    etype_names = [et[1] for et in canonical]
    # same-dst etypes must be consecutive for the fused accumulation kernel
    etype_order = sorted(canonical, key=lambda et: type_index[et[2]])
    blocks_adj = [adj_graph, adj_graph]   # n_layers = 2, same full graph for both blocks

    # padded / stacked graph tensors
    max_nodes = max(n_real.values())
    NPAD = _round_up(max_nodes, 8) if max_nodes <= 256 else _round_up(max_nodes, 256)
    _, tk = _conv_tiles(NPAD)
    x_stack = jnp.stack([_pad2(h_in[t], NPAD, FP) for t in node_types]).astype(jnp.bfloat16)
    adj_stacks, invdeg_stacks, metas = [], [], []
    for blk in blocks_adj:
        a_s, d_s, meta = stack_block(blk, etype_order, NPAD, type_index, n_real, tk)
        adj_stacks.append(a_s)
        invdeg_stacks.append(d_s)
        metas.append(meta)

    # parameters
    params = init_params(jax.random.PRNGKey(42), dim_dict, etype_names, n_layers=2)
    prep = prepare_params(params, node_types, etype_order)

    # positive / negative link-prediction graphs (customer<->product edges only)
    n_edges = 16
    e = jnp.arange(n_edges)
    pos_c, pos_p = e % n_customer, (5 * e + 1) % n_product
    neg_c, neg_p = e % n_customer, (7 * e + 3) % n_product
    pos_graph_edges = {
        ("customer", "buys", "product"): (pos_c, pos_p),
        ("product", "rev_buys", "customer"): (pos_p, pos_c),
    }
    neg_graph_edges = {
        ("customer", "buys", "product"): (neg_c, neg_p),
        ("product", "rev_buys", "customer"): (neg_p, neg_c),
    }

    # batch all score sets into one prediction call (row indices into flattened h)
    pred_sets, head_parts, tail_parts = [], [], []
    offset = 0
    for tag, graph_edges in (("pos", pos_graph_edges), ("neg", neg_graph_edges)):
        for (src, ename, dst), (s_nid, d_nid) in graph_edges.items():
            if src in ("customer", "product") and dst in ("customer", "product"):
                head_parts.append(type_index[src] * NPAD + s_nid)
                tail_parts.append(type_index[dst] * NPAD + d_nid)
                pred_sets.append((tag, ename, offset, int(s_nid.shape[0])))
                offset += int(s_nid.shape[0])
    head_idx = jnp.concatenate(head_parts).astype(jnp.int32)
    tail_idx = jnp.concatenate(tail_parts).astype(jnp.int32)
    e_total = head_idx.shape[0]
    e_pad = max(8, _round_up(e_total, 8))
    head_idx = jnp.pad(head_idx, (0, e_pad - e_total))
    tail_idx = jnp.pad(tail_idx, (0, e_pad - e_total))

    # ---- run the fused Pallas forward -------------------------------------- #
    h_pad, scores_flat = gnn_forward(prep, x_stack, adj_stacks, invdeg_stacks, metas,
                                     head_idx, tail_idx)
    jax.block_until_ready((h_pad, scores_flat))

    # unpack (strip padding)
    out_dim = dim_dict["out"]
    h_out = {t: h_pad[type_index[t], :n_real[t], :out_dim].astype(jnp.float32)
             for t in node_types}
    pos_score, neg_score = {}, {}
    for tag, ename, off, ln in pred_sets:
        s = scores_flat[off:off + ln].reshape(-1, 1)
        (pos_score if tag == "pos" else neg_score)[ename] = s

    # ---- correctness check against pure-JAX f32 reference ------------------ #
    h_ref, pos_ref, neg_ref = reference_forward(params, h_in, blocks_adj,
                                                pos_graph_edges, neg_graph_edges)
    for t in node_types:
        err = float(jnp.max(jnp.abs(h_out[t] - h_ref[t])))
        assert err < 0.15, f"h[{t}] mismatch: {err}"
    for ename in pos_score:
        err_p = float(jnp.max(jnp.abs(pos_score[ename] - pos_ref[ename])))
        err_n = float(jnp.max(jnp.abs(neg_score[ename] - neg_ref[ename])))
        assert err_p < 0.15, f"pos[{ename}] mismatch: {err_p}"
        assert err_n < 0.15, f"neg[{ename}] mismatch: {err_n}"

    # shape checks (match the torch module's outputs)
    assert h_out["customer"].shape == (n_customer, out_dim)
    assert h_out["product"].shape == (n_product, out_dim)
    assert h_out["prod_group"].shape == (n_group, out_dim)
    assert pos_score["buys"].shape == (n_edges, 1)
    assert neg_score["rev_buys"].shape == (n_edges, 1)

    print("KERNEL_OK")
</pallas_src>

<mosaic_0001>
module attributes {stable_mosaic.version = 11 : i64} {
  func.func @_node_embed_kernel(%arg0: i32, %arg1: i32, %arg2: memref<1x8x128xbf16, #tpu.memory_space<vmem>>, %arg3: memref<1x128x128xbf16, #tpu.memory_space<vmem>>, %arg4: memref<1x1x128xf32, #tpu.memory_space<vmem>>, %arg5: memref<1x128x128xbf16, #tpu.memory_space<vmem>>, %arg6: memref<1x1x128xf32, #tpu.memory_space<vmem>>, %arg7: memref<1x8x128xbf16, #tpu.memory_space<vmem>>) attributes {dimension_semantics = [#tpu.dimension_semantics<parallel>, #tpu.dimension_semantics<parallel>], iteration_bounds = array<i64: 3, 2>, scalar_prefetch = 0 : i64, scratch_operands = 0 : i64, tpu.core_type = #tpu.core_type<tc>, window_params = [{transform_indices = @transform_0, window_bounds = array<i64: 1, 8, 128>}, {transform_indices = @transform_1, window_bounds = array<i64: 1, 128, 128>}, {transform_indices = @transform_2, window_bounds = array<i64: 1, 1, 128>}, {transform_indices = @transform_3, window_bounds = array<i64: 1, 128, 128>}, {transform_indices = @transform_4, window_bounds = array<i64: 1, 1, 128>}, {transform_indices = @transform_5, window_bounds = array<i64: 1, 8, 128>}]} {
    %c0 = arith.constant 0 : index
    %c0_0 = arith.constant 0 : index
    %c0_1 = arith.constant 0 : index
    %0 = vector.load %arg2[%c0, %c0_0, %c0_1] : memref<1x8x128xbf16, #tpu.memory_space<vmem>>, vector<1x8x128xbf16>
    %1 = vector.shape_cast %0 : vector<1x8x128xbf16> to vector<8x128xbf16>
    %c0_2 = arith.constant 0 : index
    %c0_3 = arith.constant 0 : index
    %c0_4 = arith.constant 0 : index
    %2 = vector.load %arg3[%c0_2, %c0_3, %c0_4] : memref<1x128x128xbf16, #tpu.memory_space<vmem>>, vector<1x128x128xbf16>
    %3 = vector.shape_cast %2 : vector<1x128x128xbf16> to vector<128x128xbf16>
    %cst = arith.constant dense<0.000000e+00> : vector<8x128xf32>
    %4 = tpu.matmul %1, %3, %cst {dimension_numbers = #tpu.dot_dimension_numbers<[1], [0], [0], [1], [0, 0, 1, 1], [], []>} : vector<8x128xbf16>, vector<128x128xbf16>, vector<8x128xf32> -> vector<8x128xf32>
    %c0_5 = arith.constant 0 : index
    %c0_6 = arith.constant 0 : index
    %c0_7 = arith.constant 0 : index
    %5 = vector.load %arg4[%c0_5, %c0_6, %c0_7] : memref<1x1x128xf32, #tpu.memory_space<vmem>>, vector<1x1x128xf32>
    %6 = vector.shape_cast %5 : vector<1x1x128xf32> to vector<1x128xf32>
    %7 = vector.broadcast %6 : vector<1x128xf32> to vector<8x128xf32>
    %8 = arith.addf %4, %7 : vector<8x128xf32>
    %9 = arith.truncf %8 : vector<8x128xf32> to vector<8x128xbf16>
    %c0_8 = arith.constant 0 : index
    %c0_9 = arith.constant 0 : index
    %c0_10 = arith.constant 0 : index
    %10 = vector.load %arg5[%c0_8, %c0_9, %c0_10] : memref<1x128x128xbf16, #tpu.memory_space<vmem>>, vector<1x128x128xbf16>
    %11 = vector.shape_cast %10 : vector<1x128x128xbf16> to vector<128x128xbf16>
    %cst_11 = arith.constant dense<0.000000e+00> : vector<8x128xf32>
    %12 = tpu.matmul %9, %11, %cst_11 {dimension_numbers = #tpu.dot_dimension_numbers<[1], [0], [0], [1], [0, 0, 1, 1], [], []>} : vector<8x128xbf16>, vector<128x128xbf16>, vector<8x128xf32> -> vector<8x128xf32>
    %c0_12 = arith.constant 0 : index
    %c0_13 = arith.constant 0 : index
    %c0_14 = arith.constant 0 : index
    %13 = vector.load %arg6[%c0_12, %c0_13, %c0_14] : memref<1x1x128xf32, #tpu.memory_space<vmem>>, vector<1x1x128xf32>
    %14 = vector.shape_cast %13 : vector<1x1x128xf32> to vector<1x128xf32>
    %15 = vector.broadcast %14 : vector<1x128xf32> to vector<8x128xf32>
    %16 = arith.addf %12, %15 : vector<8x128xf32>
    %cst_15 = arith.constant 0.000000e+00 : f32
    %17 = vector.broadcast %cst_15 : f32 to vector<8x128xf32>
    %18 = arith.cmpf oge, %16, %17 : vector<8x128xf32>
    %cst_16 = arith.constant 0.00999999977 : f32
    %19 = vector.broadcast %cst_16 : f32 to vector<8x128xf32>
    %20 = arith.mulf %19, %16 : vector<8x128xf32>
    %21 = arith.select %18, %16, %20 : vector<8x128xi1>, vector<8x128xf32>
    %22 = arith.truncf %21 : vector<8x128xf32> to vector<8x128xbf16>
    %c0_17 = arith.constant 0 : index
    %c0_18 = arith.constant 0 : index
    %c0_19 = arith.constant 0 : index
    %23 = vector.load %arg7[%c0_17, %c0_18, %c0_19] : memref<1x8x128xbf16, #tpu.memory_space<vmem>>, vector<1x8x128xbf16>
    %24 = vector.shape_cast %23 : vector<1x8x128xbf16> to vector<8x128xbf16>
    %25 = vector.shape_cast %22 : vector<8x128xbf16> to vector<1x8x128xbf16>
    tpu.vector_store %arg7[%c0_17, %c0_18, %c0_19], %25 {strides = array<i32>} : memref<1x8x128xbf16, #tpu.memory_space<vmem>>, vector<1x8x128xbf16>,
    return
  }
  func.func @transform_0(%arg0: i32, %arg1: i32) -> (i32, i32, i32) {
    %c0_i32 = arith.constant 0 : i32
    %c0_i32_0 = arith.constant 0 : i32
    return %arg0, %arg1, %c0_i32 : i32, i32, i32
  }
  func.func @transform_1(%arg0: i32, %arg1: i32) -> (i32, i32, i32) {
    %c0_i32 = arith.constant 0 : i32
    %c0_i32_0 = arith.constant 0 : i32
    %c0_i32_1 = arith.constant 0 : i32
    return %arg0, %c0_i32, %c0_i32_0 : i32, i32, i32
  }
  func.func @transform_2(%arg0: i32, %arg1: i32) -> (i32, i32, i32) {
    %c0_i32 = arith.constant 0 : i32
    %c0_i32_0 = arith.constant 0 : i32
    %c0_i32_1 = arith.constant 0 : i32
    return %arg0, %c0_i32, %c0_i32_0 : i32, i32, i32
  }
  func.func @transform_3(%arg0: i32, %arg1: i32) -> (i32, i32, i32) {
    %c0_i32 = arith.constant 0 : i32
    %c0_i32_0 = arith.constant 0 : i32
    %c0_i32_1 = arith.constant 0 : i32
    return %arg0, %c0_i32, %c0_i32_0 : i32, i32, i32
  }
  func.func @transform_4(%arg0: i32, %arg1: i32) -> (i32, i32, i32) {
    %c0_i32 = arith.constant 0 : i32
    %c0_i32_0 = arith.constant 0 : i32
    %c0_i32_1 = arith.constant 0 : i32
    return %arg0, %c0_i32, %c0_i32_0 : i32, i32, i32
  }
  func.func @transform_5(%arg0: i32, %arg1: i32) -> (i32, i32, i32) {
    %c0_i32 = arith.constant 0 : i32
    %c0_i32_0 = arith.constant 0 : i32
    return %arg0, %arg1, %c0_i32 : i32, i32, i32
  }
}

module attributes {stable_mosaic.version = 11 : i64} {
  func.func @_pred_mlp_kernel(%arg0: i32, %arg1: memref<32x128xbf16, #tpu.memory_space<vmem>>, %arg2: memref<32x128xbf16, #tpu.memory_space<vmem>>, %arg3: memref<256x128xbf16, #tpu.memory_space<vmem>>, %arg4: memref<1x128xf32, #tpu.memory_space<vmem>>, %arg5: memref<128x128xbf16, #tpu.memory_space<vmem>>, %arg6: memref<1x128xf32, #tpu.memory_space<vmem>>, %arg7: memref<128x128xbf16, #tpu.memory_space<vmem>>, %arg8: memref<1x128xf32, #tpu.memory_space<vmem>>, %arg9: memref<32x128xf32, #tpu.memory_space<vmem>>) attributes {dimension_semantics = [#tpu.dimension_semantics<parallel>], iteration_bounds = array<i64: 2>, scalar_prefetch = 0 : i64, scratch_operands = 0 : i64, tpu.core_type = #tpu.core_type<tc>, window_params = [{transform_indices = @transform_0, window_bounds = array<i64: 32, 128>}, {transform_indices = @transform_1, window_bounds = array<i64: 32, 128>}, {pipeline_mode = #tpu.pipeline_mode<synchronous>, transform_indices = @transform_2, window_bounds = array<i64: 256, 128>}, {pipeline_mode = #tpu.pipeline_mode<synchronous>, transform_indices = @transform_3, window_bounds = array<i64: 1, 128>}, {pipeline_mode = #tpu.pipeline_mode<synchronous>, transform_indices = @transform_4, window_bounds = array<i64: 128, 128>}, {pipeline_mode = #tpu.pipeline_mode<synchronous>, transform_indices = @transform_5, window_bounds = array<i64: 1, 128>}, {pipeline_mode = #tpu.pipeline_mode<synchronous>, transform_indices = @transform_6, window_bounds = array<i64: 128, 128>}, {pipeline_mode = #tpu.pipeline_mode<synchronous>, transform_indices = @transform_7, window_bounds = array<i64: 1, 128>}, {transform_indices = @transform_8, window_bounds = array<i64: 32, 128>}]} {
    %c0 = arith.constant 0 : index
    %c0_0 = arith.constant 0 : index
    %0 = vector.load %arg1[%c0, %c0_0] : memref<32x128xbf16, #tpu.memory_space<vmem>>, vector<32x128xbf16>
    %c0_1 = arith.constant 0 : index
    %c0_2 = arith.constant 0 : index
    %1 = vector.load %arg2[%c0_1, %c0_2] : memref<32x128xbf16, #tpu.memory_space<vmem>>, vector<32x128xbf16>
    %2 = tpu.concatenate %0, %1 in 1 : vector<32x128xbf16>, vector<32x128xbf16> -> vector<32x256xbf16>
    %c0_3 = arith.constant 0 : index
    %c0_4 = arith.constant 0 : index
    %3 = vector.load %arg3[%c0_3, %c0_4] : memref<256x128xbf16, #tpu.memory_space<vmem>>, vector<256x128xbf16>
    %cst = arith.constant dense<0.000000e+00> : vector<32x128xf32>
    %4 = tpu.matmul %2, %3, %cst {dimension_numbers = #tpu.dot_dimension_numbers<[1], [0], [0], [1], [0, 0, 1, 1], [], []>} : vector<32x256xbf16>, vector<256x128xbf16>, vector<32x128xf32> -> vector<32x128xf32>
    %c0_5 = arith.constant 0 : index
    %c0_6 = arith.constant 0 : index
    %5 = vector.load %arg4[%c0_5, %c0_6] : memref<1x128xf32, #tpu.memory_space<vmem>>, vector<1x128xf32>
    %6 = vector.broadcast %5 : vector<1x128xf32> to vector<32x128xf32>
    %7 = arith.addf %4, %6 : vector<32x128xf32>
    %cst_7 = arith.constant 0.000000e+00 : f32
    %8 = vector.broadcast %cst_7 : f32 to vector<32x128xf32>
    %9 = arith.cmpf ogt, %7, %8 : vector<32x128xf32>
    %10 = math.exp %7 : vector<32x128xf32>
    %cst_8 = arith.constant 1.000000e+00 : f32
    %11 = vector.broadcast %cst_8 : f32 to vector<32x128xf32>
    %12 = arith.subf %10, %11 : vector<32x128xf32>
    %cst_9 = arith.constant 1.67326319 : f32
    %13 = vector.broadcast %cst_9 : f32 to vector<32x128xf32>
    %14 = arith.mulf %13, %12 : vector<32x128xf32>
    %15 = arith.select %9, %7, %14 : vector<32x128xi1>, vector<32x128xf32>
    %cst_10 = arith.constant 1.05070102 : f32
    %16 = vector.broadcast %cst_10 : f32 to vector<32x128xf32>
    %17 = arith.mulf %16, %15 : vector<32x128xf32>
    %18 = arith.truncf %17 : vector<32x128xf32> to vector<32x128xbf16>
    %c0_11 = arith.constant 0 : index
    %c0_12 = arith.constant 0 : index
    %19 = vector.load %arg5[%c0_11, %c0_12] : memref<128x128xbf16, #tpu.memory_space<vmem>>, vector<128x128xbf16>
    %cst_13 = arith.constant dense<0.000000e+00> : vector<32x128xf32>
    %20 = tpu.matmul %18, %19, %cst_13 {dimension_numbers = #tpu.dot_dimension_numbers<[1], [0], [0], [1], [0, 0, 1, 1], [], []>} : vector<32x128xbf16>, vector<128x128xbf16>, vector<32x128xf32> -> vector<32x128xf32>
    %c0_14 = arith.constant 0 : index
    %c0_15 = arith.constant 0 : index
    %21 = vector.load %arg6[%c0_14, %c0_15] : memref<1x128xf32, #tpu.memory_space<vmem>>, vector<1x128xf32>
    %22 = vector.broadcast %21 : vector<1x128xf32> to vector<32x128xf32>
    %23 = arith.addf %20, %22 : vector<32x128xf32>
    %cst_16 = arith.constant 0.000000e+00 : f32
    %24 = vector.broadcast %cst_16 : f32 to vector<32x128xf32>
    %25 = arith.cmpf ogt, %23, %24 : vector<32x128xf32>
    %26 = math.exp %23 : vector<32x128xf32>
    %cst_17 = arith.constant 1.000000e+00 : f32
    %27 = vector.broadcast %cst_17 : f32 to vector<32x128xf32>
    %28 = arith.subf %26, %27 : vector<32x128xf32>
    %cst_18 = arith.constant 1.67326319 : f32
    %29 = vector.broadcast %cst_18 : f32 to vector<32x128xf32>
    %30 = arith.mulf %29, %28 : vector<32x128xf32>
    %31 = arith.select %25, %23, %30 : vector<32x128xi1>, vector<32x128xf32>
    %cst_19 = arith.constant 1.05070102 : f32
    %32 = vector.broadcast %cst_19 : f32 to vector<32x128xf32>
    %33 = arith.mulf %32, %31 : vector<32x128xf32>
    %34 = arith.truncf %33 : vector<32x128xf32> to vector<32x128xbf16>
    %c0_20 = arith.constant 0 : index
    %c0_21 = arith.constant 0 : index
    %35 = vector.load %arg7[%c0_20, %c0_21] : memref<128x128xbf16, #tpu.memory_space<vmem>>, vector<128x128xbf16>
    %cst_22 = arith.constant dense<0.000000e+00> : vector<32x128xf32>
    %36 = tpu.matmul %34, %35, %cst_22 {dimension_numbers = #tpu.dot_dimension_numbers<[1], [0], [0], [1], [0, 0, 1, 1], [], []>} : vector<32x128xbf16>, vector<128x128xbf16>, vector<32x128xf32> -> vector<32x128xf32>
    %c0_23 = arith.constant 0 : index
    %c0_24 = arith.constant 0 : index
    %37 = vector.load %arg8[%c0_23, %c0_24] : memref<1x128xf32, #tpu.memory_space<vmem>>, vector<1x128xf32>
    %38 = vector.broadcast %37 : vector<1x128xf32> to vector<32x128xf32>
    %39 = arith.addf %36, %38 : vector<32x128xf32>
    %c0_25 = arith.constant 0 : index
    %c0_26 = arith.constant 0 : index
    %40 = vector.load %arg9[%c0_25, %c0_26] : memref<32x128xf32, #tpu.memory_space<vmem>>, vector<32x128xf32>
    tpu.vector_store %arg9[%c0_25, %c0_26], %39 {strides = array<i32>} : memref<32x128xf32, #tpu.memory_space<vmem>>, vector<32x128xf32>,
    return
  }
  func.func @transform_0(%arg0: i32) -> (i32, i32) {
    %c0_i32 = arith.constant 0 : i32
    %c0_i32_0 = arith.constant 0 : i32
    return %arg0, %c0_i32 : i32, i32
  }
  func.func @transform_1(%arg0: i32) -> (i32, i32) {
    %c0_i32 = arith.constant 0 : i32
    %c0_i32_0 = arith.constant 0 : i32
    return %arg0, %c0_i32 : i32, i32
  }
  func.func @transform_2(%arg0: i32) -> (i32, i32) {
    %c0_i32 = arith.constant 0 : i32
    %c0_i32_0 = arith.constant 0 : i32
    %c0_i32_1 = arith.constant 0 : i32
    return %c0_i32, %c0_i32_0 : i32, i32
  }
  func.func @transform_3(%arg0: i32) -> (i32, i32) {
    %c0_i32 = arith.constant 0 : i32
    %c0_i32_0 = arith.constant 0 : i32
    %c0_i32_1 = arith.constant 0 : i32
    return %c0_i32, %c0_i32_0 : i32, i32
  }
  func.func @transform_4(%arg0: i32) -> (i32, i32) {
    %c0_i32 = arith.constant 0 : i32
    %c0_i32_0 = arith.constant 0 : i32
    %c0_i32_1 = arith.constant 0 : i32
    return %c0_i32, %c0_i32_0 : i32, i32
  }
  func.func @transform_5(%arg0: i32) -> (i32, i32) {
    %c0_i32 = arith.constant 0 : i32
    %c0_i32_0 = arith.constant 0 : i32
    %c0_i32_1 = arith.constant 0 : i32
    return %c0_i32, %c0_i32_0 : i32, i32
  }
  func.func @transform_6(%arg0: i32) -> (i32, i32) {
    %c0_i32 = arith.constant 0 : i32
    %c0_i32_0 = arith.constant 0 : i32
    %c0_i32_1 = arith.constant 0 : i32
    return %c0_i32, %c0_i32_0 : i32, i32
  }
  func.func @transform_7(%arg0: i32) -> (i32, i32) {
    %c0_i32 = arith.constant 0 : i32
    %c0_i32_0 = arith.constant 0 : i32
    %c0_i32_1 = arith.constant 0 : i32
    return %c0_i32, %c0_i32_0 : i32, i32
  }
  func.func @transform_8(%arg0: i32) -> (i32, i32) {
    %c0_i32 = arith.constant 0 : i32
    %c0_i32_0 = arith.constant 0 : i32
    return %arg0, %c0_i32 : i32, i32
  }
}

module attributes {stable_mosaic.version = 11 : i64} {
  func.func @_hetero_conv_kernel(%arg0: i32, %arg1: i32, %arg2: i32, %arg3: memref<4xi32, #tpu.memory_space<smem>>, %arg4: memref<4xi32, #tpu.memory_space<smem>>, %arg5: memref<4xi32, #tpu.memory_space<smem>>, %arg6: memref<4xi32, #tpu.memory_space<smem>>, %arg7: memref<4xi32, #tpu.memory_space<smem>>, %arg8: memref<1x8x16xbf16, #tpu.memory_space<vmem>>, %arg9: memref<1x16x128xbf16, #tpu.memory_space<vmem>>, %arg10: memref<1x8x128xbf16, #tpu.memory_space<vmem>>, %arg11: memref<1x8x1xf32, #tpu.memory_space<vmem>>, %arg12: memref<4x256x128xbf16, #tpu.memory_space<vmem>>, %arg13: memref<1x8x128xbf16, #tpu.memory_space<vmem>>, %arg14: memref<8x128xf32, #tpu.memory_space<vmem>>, %arg15: memref<8x128xf32, #tpu.memory_space<vmem>>) attributes {dimension_semantics = [#tpu.dimension_semantics<parallel>, #tpu.dimension_semantics<arbitrary>, #tpu.dimension_semantics<arbitrary>], iteration_bounds = array<i64: 2, 4, 1>, scalar_prefetch = 5 : i64, scratch_operands = 2 : i64, tpu.core_type = #tpu.core_type<tc>, window_params = [{transform_indices = @transform_0, window_bounds = array<i64: 1, 8, 16>}, {transform_indices = @transform_1, window_bounds = array<i64: 1, 16, 128>}, {transform_indices = @transform_2, window_bounds = array<i64: 1, 8, 128>}, {transform_indices = @transform_3, window_bounds = array<i64: 1, 8, 1>}, {pipeline_mode = #tpu.pipeline_mode<synchronous>, transform_indices = @transform_4, window_bounds = array<i64: 4, 256, 128>}, {transform_indices = @transform_5, window_bounds = array<i64: 1, 8, 128>}]} {
    %c0_i32 = arith.constant 0 : i32
    %0 = arith.cmpi eq, %arg2, %c0_i32 : i32
    %1 = arith.extui %0 : i1 to i32
    %c0_i32_0 = arith.constant 0 : i32
    %2 = arith.cmpi ne, %1, %c0_i32_0 : i32
    scf.if %2 {
      %cst = arith.constant 0.000000e+00 : f32
      %25 = vector.broadcast %cst : f32 to vector<8x128xf32>
      %c0 = arith.constant 0 : index
      %c0_9 = arith.constant 0 : index
      %26 = vector.load %arg14[%c0, %c0_9] : memref<8x128xf32, #tpu.memory_space<vmem>>, vector<8x128xf32>
      tpu.vector_store %arg14[%c0, %c0_9], %25 {strides = array<i32>} : memref<8x128xf32, #tpu.memory_space<vmem>>, vector<8x128xf32>,
    } else {
    }
    %3 = arith.index_cast %arg1 : i32 to index
    %4 = memref.load %arg5[%3] : memref<4xi32, #tpu.memory_space<smem>>
    %c1_i32 = arith.constant 1 : i32
    %5 = arith.cmpi eq, %4, %c1_i32 : i32
    %c0_i32_1 = arith.constant 0 : i32
    %6 = arith.cmpi eq, %arg2, %c0_i32_1 : i32
    %7 = arith.andi %5, %6 : i1
    %8 = arith.extui %7 : i1 to i32
    %c0_i32_2 = arith.constant 0 : i32
    %9 = arith.cmpi ne, %8, %c0_i32_2 : i32
    scf.if %9 {
      %cst = arith.constant 0.000000e+00 : f32
      %25 = vector.broadcast %cst : f32 to vector<8x128xf32>
      %c0 = arith.constant 0 : index
      %c0_9 = arith.constant 0 : index
      %26 = vector.load %arg15[%c0, %c0_9] : memref<8x128xf32, #tpu.memory_space<vmem>>, vector<8x128xf32>
      tpu.vector_store %arg15[%c0, %c0_9], %25 {strides = array<i32>} : memref<8x128xf32, #tpu.memory_space<vmem>>, vector<8x128xf32>,
    } else {
    }
    %10 = arith.index_cast %arg1 : i32 to index
    %11 = memref.load %arg7[%10] : memref<4xi32, #tpu.memory_space<smem>>
    %12 = arith.cmpi slt, %arg2, %11 : i32
    %13 = arith.extui %12 : i1 to i32
    %c0_i32_3 = arith.constant 0 : i32
    %14 = arith.cmpi ne, %13, %c0_i32_3 : i32
    scf.if %14 {
      %c0 = arith.constant 0 : index
      %c0_9 = arith.constant 0 : index
      %25 = vector.load %arg14[%c0, %c0_9] : memref<8x128xf32, #tpu.memory_space<vmem>>, vector<8x128xf32>
      %c0_10 = arith.constant 0 : index
      %c0_11 = arith.constant 0 : index
      %c0_12 = arith.constant 0 : index
      %26 = vector.load %arg8[%c0_10, %c0_11, %c0_12] : memref<1x8x16xbf16, #tpu.memory_space<vmem>>, vector<1x8x16xbf16>
      %27 = vector.shape_cast %26 : vector<1x8x16xbf16> to vector<8x16xbf16>
      %c0_13 = arith.constant 0 : index
      %c0_14 = arith.constant 0 : index
      %c0_15 = arith.constant 0 : index
      %28 = vector.load %arg9[%c0_13, %c0_14, %c0_15] : memref<1x16x128xbf16, #tpu.memory_space<vmem>>, vector<1x16x128xbf16>
      %29 = vector.shape_cast %28 : vector<1x16x128xbf16> to vector<16x128xbf16>
      %cst = arith.constant dense<0.000000e+00> : vector<8x128xf32>
      %30 = tpu.matmul %27, %29, %cst {dimension_numbers = #tpu.dot_dimension_numbers<[1], [0], [0], [1], [0, 0, 1, 1], [], []>} : vector<8x16xbf16>, vector<16x128xbf16>, vector<8x128xf32> -> vector<8x128xf32>
      %31 = arith.addf %25, %30 : vector<8x128xf32>
      %c0_16 = arith.constant 0 : index
      %c0_17 = arith.constant 0 : index
      %32 = vector.load %arg14[%c0_16, %c0_17] : memref<8x128xf32, #tpu.memory_space<vmem>>, vector<8x128xf32>
      tpu.vector_store %arg14[%c0_16, %c0_17], %31 {strides = array<i32>} : memref<8x128xf32, #tpu.memory_space<vmem>>, vector<8x128xf32>,
    } else {
    }
    %c0_i32_4 = arith.constant 0 : i32
    %15 = arith.cmpi eq, %arg2, %c0_i32_4 : i32
    %16 = arith.extui %15 : i1 to i32
    %c0_i32_5 = arith.constant 0 : i32
    %17 = arith.cmpi ne, %16, %c0_i32_5 : i32
    scf.if %17 {
      %c0 = arith.constant 0 : index
      %c0_9 = arith.constant 0 : index
      %25 = vector.load %arg14[%c0, %c0_9] : memref<8x128xf32, #tpu.memory_space<vmem>>, vector<8x128xf32>
      %c0_10 = arith.constant 0 : index
      %c0_11 = arith.constant 0 : index
      %c0_12 = arith.constant 0 : index
      %26 = vector.load %arg11[%c0_10, %c0_11, %c0_12] : memref<1x8x1xf32, #tpu.memory_space<vmem>>, vector<1x8x1xf32>
      %27 = vector.shape_cast %26 : vector<1x8x1xf32> to vector<8x1xf32>
      %28 = vector.broadcast %27 : vector<8x1xf32> to vector<8x128xf32>
      %29 = arith.mulf %25, %28 : vector<8x128xf32>
      %30 = arith.truncf %29 : vector<8x128xf32> to vector<8x128xbf16>
      %c0_13 = arith.constant 0 : index
      %c0_14 = arith.constant 0 : index
      %c0_15 = arith.constant 0 : index
      %31 = vector.load %arg10[%c0_13, %c0_14, %c0_15] : memref<1x8x128xbf16, #tpu.memory_space<vmem>>, vector<1x8x128xbf16>
      %32 = vector.shape_cast %31 : vector<1x8x128xbf16> to vector<8x128xbf16>
      %33 = tpu.concatenate %32, %30 in 1 : vector<8x128xbf16>, vector<8x128xbf16> -> vector<8x256xbf16>
      %34 = arith.index_cast %arg1 : i32 to index
      %c0_16 = arith.constant 0 : index
      %c0_17 = arith.constant 0 : index
      %35 = vector.load %arg12[%34, %c0_16, %c0_17] : memref<4x256x128xbf16, #tpu.memory_space<vmem>>, vector<1x256x128xbf16>
      %36 = vector.shape_cast %35 : vector<1x256x128xbf16> to vector<256x128xbf16>
      %cst = arith.constant dense<0.000000e+00> : vector<8x128xf32>
      %37 = tpu.matmul %33, %36, %cst {dimension_numbers = #tpu.dot_dimension_numbers<[1], [0], [0], [1], [0, 0, 1, 1], [], []>} : vector<8x256xbf16>, vector<256x128xbf16>, vector<8x128xf32> -> vector<8x128xf32>
      %cst_18 = arith.constant 0.000000e+00 : f32
      %38 = vector.broadcast %cst_18 : f32 to vector<8x128xf32>
      %39 = arith.maximumf %37, %38 : vector<8x128xf32>
      %40 = arith.mulf %39, %39 : vector<8x128xf32>
      %cst_19 = arith.constant dense<0.000000e+00> : vector<8xf32>
      %41 = vector.multi_reduction <add>, %40, %cst_19 [1] : vector<8x128xf32> to vector<8xf32>
      %42 = vector.shape_cast %41 : vector<8xf32> to vector<8x1xf32>
      %cst_20 = arith.constant 0.000000e+00 : f32
      %43 = vector.broadcast %cst_20 : f32 to vector<8x1xf32>
      %44 = arith.cmpf ogt, %42, %43 : vector<8x1xf32>
      %45 = math.rsqrt %42 : vector<8x1xf32>
      %cst_21 = arith.constant 1.000000e+00 : f32
      %46 = vector.broadcast %cst_21 : f32 to vector<8x1xf32>
      %47 = arith.select %44, %45, %46 : vector<8x1xi1>, vector<8x1xf32>
      %c0_22 = arith.constant 0 : index
      %c0_23 = arith.constant 0 : index
      %48 = vector.load %arg15[%c0_22, %c0_23] : memref<8x128xf32, #tpu.memory_space<vmem>>, vector<8x128xf32>
      %49 = vector.broadcast %47 : vector<8x1xf32> to vector<8x128xf32>
      %50 = arith.mulf %39, %49 : vector<8x128xf32>
      %51 = arith.addf %48, %50 : vector<8x128xf32>
      %c0_24 = arith.constant 0 : index
      %c0_25 = arith.constant 0 : index
      %52 = vector.load %arg15[%c0_24, %c0_25] : memref<8x128xf32, #tpu.memory_space<vmem>>, vector<8x128xf32>
      tpu.vector_store %arg15[%c0_24, %c0_25], %51 {strides = array<i32>} : memref<8x128xf32, #tpu.memory_space<vmem>>, vector<8x128xf32>,
    } else {
    }
    %18 = arith.index_cast %arg1 : i32 to index
    %19 = memref.load %arg6[%18] : memref<4xi32, #tpu.memory_space<smem>>
    %c1_i32_6 = arith.constant 1 : i32
    %20 = arith.cmpi eq, %19, %c1_i32_6 : i32
    %c0_i32_7 = arith.constant 0 : i32
    %21 = arith.cmpi eq, %arg2, %c0_i32_7 : i32
    %22 = arith.andi %20, %21 : i1
    %23 = arith.extui %22 : i1 to i32
    %c0_i32_8 = arith.constant 0 : i32
    %24 = arith.cmpi ne, %23, %c0_i32_8 : i32
    scf.if %24 {
      %c0 = arith.constant 0 : index
      %c0_9 = arith.constant 0 : index
      %25 = vector.load %arg15[%c0, %c0_9] : memref<8x128xf32, #tpu.memory_space<vmem>>, vector<8x128xf32>
      %26 = arith.truncf %25 : vector<8x128xf32> to vector<8x128xbf16>
      %c0_10 = arith.constant 0 : index
      %c0_11 = arith.constant 0 : index
      %c0_12 = arith.constant 0 : index
      %27 = vector.load %arg13[%c0_10, %c0_11, %c0_12] : memref<1x8x128xbf16, #tpu.memory_space<vmem>>, vector<1x8x128xbf16>
      %28 = vector.shape_cast %27 : vector<1x8x128xbf16> to vector<8x128xbf16>
      %29 = vector.shape_cast %26 : vector<8x128xbf16> to vector<1x8x128xbf16>
      tpu.vector_store %arg13[%c0_10, %c0_11, %c0_12], %29 {strides = array<i32>} : memref<1x8x128xbf16, #tpu.memory_space<vmem>>, vector<1x8x128xbf16>,
    } else {
    }
    return
  }
  func.func @transform_0(%arg0: i32, %arg1: i32, %arg2: i32, %arg3: memref<4xi32, #tpu.memory_space<smem>>, %arg4: memref<4xi32, #tpu.memory_space<smem>>, %arg5: memref<4xi32, #tpu.memory_space<smem>>, %arg6: memref<4xi32, #tpu.memory_space<smem>>, %arg7: memref<4xi32, #tpu.memory_space<smem>>) -> (i32, i32, i32) {
    %0 = arith.index_cast %arg1 : i32 to index
    %1 = memref.load %arg7[%0] : memref<4xi32, #tpu.memory_space<smem>>
    %c1_i32 = arith.constant 1 : i32
    %2 = arith.subi %1, %c1_i32 : i32
    %3 = arith.minsi %arg2, %2 : i32
    %c0_i32 = arith.constant 0 : i32
    return %arg1, %arg0, %3 : i32, i32, i32
  }
  func.func @transform_1(%arg0: i32, %arg1: i32, %arg2: i32, %arg3: memref<4xi32, #tpu.memory_space<smem>>, %arg4: memref<4xi32, #tpu.memory_space<smem>>, %arg5: memref<4xi32, #tpu.memory_space<smem>>, %arg6: memref<4xi32, #tpu.memory_space<smem>>, %arg7: memref<4xi32, #tpu.memory_space<smem>>) -> (i32, i32, i32) {
    %0 = arith.index_cast %arg1 : i32 to index
    %1 = memref.load %arg3[%0] : memref<4xi32, #tpu.memory_space<smem>>
    %2 = arith.index_cast %arg1 : i32 to index
    %3 = memref.load %arg7[%2] : memref<4xi32, #tpu.memory_space<smem>>
    %c1_i32 = arith.constant 1 : i32
    %4 = arith.subi %3, %c1_i32 : i32
    %5 = arith.minsi %arg2, %4 : i32
    %c0_i32 = arith.constant 0 : i32
    %c0_i32_0 = arith.constant 0 : i32
    return %1, %5, %c0_i32 : i32, i32, i32
  }
  func.func @transform_2(%arg0: i32, %arg1: i32, %arg2: i32, %arg3: memref<4xi32, #tpu.memory_space<smem>>, %arg4: memref<4xi32, #tpu.memory_space<smem>>, %arg5: memref<4xi32, #tpu.memory_space<smem>>, %arg6: memref<4xi32, #tpu.memory_space<smem>>, %arg7: memref<4xi32, #tpu.memory_space<smem>>) -> (i32, i32, i32) {
    %0 = arith.index_cast %arg1 : i32 to index
    %1 = memref.load %arg4[%0] : memref<4xi32, #tpu.memory_space<smem>>
    %c0_i32 = arith.constant 0 : i32
    %c0_i32_0 = arith.constant 0 : i32
    return %1, %arg0, %c0_i32 : i32, i32, i32
  }
  func.func @transform_3(%arg0: i32, %arg1: i32, %arg2: i32, %arg3: memref<4xi32, #tpu.memory_space<smem>>, %arg4: memref<4xi32, #tpu.memory_space<smem>>, %arg5: memref<4xi32, #tpu.memory_space<smem>>, %arg6: memref<4xi32, #tpu.memory_space<smem>>, %arg7: memref<4xi32, #tpu.memory_space<smem>>) -> (i32, i32, i32) {
    %c0_i32 = arith.constant 0 : i32
    %c0_i32_0 = arith.constant 0 : i32
    return %arg1, %arg0, %c0_i32 : i32, i32, i32
  }
  func.func @transform_4(%arg0: i32, %arg1: i32, %arg2: i32, %arg3: memref<4xi32, #tpu.memory_space<smem>>, %arg4: memref<4xi32, #tpu.memory_space<smem>>, %arg5: memref<4xi32, #tpu.memory_space<smem>>, %arg6: memref<4xi32, #tpu.memory_space<smem>>, %arg7: memref<4xi32, #tpu.memory_space<smem>>) -> (i32, i32, i32) {
    %c0_i32 = arith.constant 0 : i32
    %c0_i32_0 = arith.constant 0 : i32
    %c0_i32_1 = arith.constant 0 : i32
    %c0_i32_2 = arith.constant 0 : i32
    return %c0_i32, %c0_i32_0, %c0_i32_1 : i32, i32, i32
  }
  func.func @transform_5(%arg0: i32, %arg1: i32, %arg2: i32, %arg3: memref<4xi32, #tpu.memory_space<smem>>, %arg4: memref<4xi32, #tpu.memory_space<smem>>, %arg5: memref<4xi32, #tpu.memory_space<smem>>, %arg6: memref<4xi32, #tpu.memory_space<smem>>, %arg7: memref<4xi32, #tpu.memory_space<smem>>) -> (i32, i32, i32) {
    %0 = arith.index_cast %arg1 : i32 to index
    %1 = memref.load %arg4[%0] : memref<4xi32, #tpu.memory_space<smem>>
    %c0_i32 = arith.constant 0 : i32
    %c0_i32_0 = arith.constant 0 : i32
    return %1, %arg0, %c0_i32 : i32, i32, i32
  }
}

</mosaic_0001>

<bundles_post_ra>
// kernel: gnn_forward.5
= control target key start
LH: loop header
LB: loop body
LE: loop exit
PB: predicated region body
PF: predicated region fallthrough
CT: control target
= control target key end

     0   :  { %s1237_s19 = smov [#allocation5]   ;;  %s1238_s20 = smov [#allocation6]   ;;  %s1455_s0 = inlined_call_operand.vmem [shape: s32[4], index: 0, kind: input, shape index: {}]   ;;  %s1456_s5 = inlined_call_operand.vmem [shape: bf16[4,16,16], index: 5, kind: input, shape index: {}]   ;;  %s1457_s6 = inlined_call_operand.vmem [shape: bf16[3,16,128], index: 6, kind: input, shape index: {}, may-alias: {6,7}]   ;;  %s1458_s7 = inlined_call_operand.vmem [shape: bf16[3,16,128], index: 7, kind: input, shape index: {}, may-alias: {6,7}]   ;;  %s1459_s8 = inlined_call_operand.vmem [shape: f32[4,16,1], index: 8, kind: input, shape index: {}]   ;;  %s1460_s9 = inlined_call_operand.hbm [shape: bf16[4,256,128], index: 9, kind: input, shape index: {}]   ;;  %s1461_s10 = inlined_call_operand.vmem [shape: bf16[3,16,128], index: 10, kind: output, shape index: {}]   ;;  %s1462_s1 = inlined_call_operand.vmem [shape: s32[4], index: 1, kind: input, shape index: {}]   ;;  %s1463_s2 = inlined_call_operand.vmem [shape: s32[4], index: 2, kind: input, shape index: {}]   ;;  %s1464_s3 = inlined_call_operand.vmem [shape: s32[4], index: 3, kind: input, shape index: {}]   ;;  %s1465_s4 = inlined_call_operand.vmem [shape: s32[4], index: 4, kind: input, shape index: {}]  }
   0x1   :  { %1466 = sst [smem:[#allocation15_spill]] %s1456_s5  ;;  %s16_s15 = sshll.u32 %s1455_s0, 4  ;;  %s17_s15 = int_to_ptr.vmem [resolvable:$true] %s16_s15 }
   0x2   :  { %1467 = sst [smem:[#allocation16_spill]] %s1459_s8  ;;  %s21_s18 = sshll.u32 %s1462_s1, 4  ;;  %s22_s18 = int_to_ptr.vmem [resolvable:$true] %s21_s18 }
   0x3   :  { %1468 = sst [smem:[#allocation17_spill]] %s1460_s9  ;;  %s26_s23 = sshll.u32 %s1463_s2, 4  ;;  %s27_s23 = int_to_ptr.vmem [resolvable:$true] %s26_s23 }
   0x4   :  { %19 = dma.vmem_to_smem %s17_s15, 16, %s1237_s19, [#allocation4] }
   0x5   :  { %24 = dma.vmem_to_smem %s22_s18, 16, %s1238_s20, [#allocation4] }
   0x6   :  { %s31_s26 = sshll.u32 %s1464_s3, 4  ;;  %s1239_s0 = smov [#allocation7]   ;;  %s32_s26 = int_to_ptr.vmem [resolvable:$true] %s31_s26 }
   0x7   :  { %29 = dma.vmem_to_smem %s27_s23, 16, %s1239_s0, [#allocation4] }
   0x8   :  { %s1240_s27 = smov [#allocation8]   ;;  %s36_s29 = sshll.u32 %s1465_s4, 4  ;;  %s37_s29 = int_to_ptr.vmem [resolvable:$true] %s36_s29 }
   0x9   :  { %34 = dma.vmem_to_smem %s32_s26, 16, %s1240_s27, [#allocation4] }
   0xa   :  { %s1241_s30 = smov [#allocation9]  }
   0xb   :  { %39 = dma.vmem_to_smem %s37_s29, 16, %s1241_s30, [#allocation4] }
   0xc   :  { %1211 = dma.done.wait [#allocation4], 80 }
   0xd   :  { %1212 = vsyncadd [#allocation4], 4294967216 }
   0xe   :  { %42 = sfence }
   0xf   :  { %43 = vsyncpa [#allocation11], 0  ;;  %s1318_s2 = smov 0   ;;  %s1320_s11 = smov 0  }
  0x10   :  { %s1322_s3 = smov 0   ;;  %s1324_s12 = smov 0  }
  0x11   :  { %s1326_s13 = smov 0  }
  0x12 LB: > { %s907_s4 = sadd.s32 4294967295, %s1235_s13   ;;  %s64_s14 = sadd.s32 1, %s1227_s3  ;;  %s1235_s13 = sphi %s1326_s13, %s49_s13   ;;  %s1231_s12 = sphi %s1324_s12, %s1479_s12   ;;  %s1227_s3 = sphi %s1322_s3, %s1478_s3   ;;  %s1223_s11 = sphi %s1320_s11, %s1477_s11   ;;  %s1219_s2 = sphi %s1318_s2, %s1476_s2  }
  0x13   : > { %p66_p0 = scmp.ge.s32.totalorder %s64_s14, 4  ;;  %s68_s15 = sadd.s32 1, %s1231_s12 }
  0x14   : > { %p917_p1 = scmp.ge.s32.totalorder %s1235_s13, 1  ;;  %p258_p2 = scmp.lt.s32.totalorder %s1235_s13, 9 }
  0x15   : > { %s1481_s14 = smov (%p66_p0, %s64_s14), 0  ;;  %s1483_s15 = smov (!%p66_p0, %s68_s15), %s1231_s12 }
  0x16   : > { %p1351_p3 = pnand %p917_p1, %p258_p2  ;;  %p70_p4 = scmp.ge.s32.totalorder %s1483_s15, 2 }
  0x17   : > { %p1355_p5 = scmp.eq.s32.totalorder %s907_s4, 0  ;;  %s1471_s9 = sld [smem:[#allocation17_spill]] }
  0x18   : > { %p1041_p6 = pneg %p1351_p3  ;;  %s1485_s15 = smov (%p70_p4, %s1483_s15), 0 }
  0x19   : > { %1472 = sst [smem:[#allocation14_spill]] %s1485_s15  ;;  %s1242_s21 = smov [#allocation10]  }
  0x1a   : > { %s271_s22 = sshll.u32 %s1242_s21, 4  ;;  %p1042_p7 = pnand %p1355_p5, %p1041_p6  ;;  %s272_s22 = int_to_ptr.vmem [resolvable:$true] %s271_s22 }
  0x1b   : > { %s1243_s23 = smov 64   ;;  %s1244_s24 = smov 4  }
  0x1c   : > { %356 = sbr.rel (%p1351_p3) target bundleno = 617 (0x269), region = 40 }
  0x1d   : > { %s269_s20 = sshll.u32 %s1471_s9, 4  ;;  %s270_s20 = int_to_ptr.hbm [resolvable:$true] %s269_s20 }
  0x1e   : > { %1044 = dma.hbm_to_vmem [thread:$0]  (!%p1042_p7), %s270_s20, 8192, %s272_s22, [#allocation11], %s1243_s23, %s1243_s23, %s1244_s24  }
  0x21   : > { %1214 = dma.done.wait (%p1355_p5), [#allocation11], 8192  }
  0x22   : > { %1216 = vsyncadd (%p1355_p5), [#allocation11], 4294959104  ;;  %p434_p8 = scmp.lt.s32.totalorder %s1219_s2, 3  ;;  %p436_p9 = scmp.lt.s32.totalorder %s1223_s11, 1  ;;  %v1245_v0 = vmov 0.0  }
  0x23   : > { %s430_s25 = sld [smem:[#allocation9 + %s1219_s2]]  ;;  %502 = vst [vmem:[#allocation2] sm:$0xff] %v1245_v0 }
  0x24   : > { %s435_s26 = scalar_select %p434_p8, %s1219_s2, 3 }
  0x25   : > { %s1487_s11 = smov (!%p436_p9, %s1223_s11), 1  ;;  %s450_s27 = sld [smem:[#allocation9 + %s1219_s2]] }
  0x26   : > { %s927_s0 = sshll.u32 %s435_s26, 1  ;;  %s449_s28 = sld [smem:[#allocation5 + %s1219_s2]] }
  0x27   : > { %s484_s1 = sadd.s32 %s927_s0, %s1487_s11  ;;  %s1473_s8 = sld [smem:[#allocation16_spill]] }
  0x28   : > { %s937_s29 = sshll.u32 %s484_s1, 3  ;;  %s469_s18 = sld [smem:[#allocation6 + %s1219_s2]] }
  0x29   : > { %s922_s30 = sadd.s32 4294967295, %s430_s25  ;;  %s503_s21 = sld [smem:[#allocation7 + %s1219_s2]] }
  0x2a   : > { %p923_p10 = scmp.gt.s32.totalorder %s922_s30, 0  ;;  %p925_p11 = scmp.lt.s32.totalorder %s922_s30, 0 }
  0x2b   : > { %s929_s19 = sadd.s32 4294967295, %s450_s27  ;;  %s487_s24 = sld [smem:[#allocation6 + %s1219_s2]] }
  0x2c   : > { %s1489_s30 = smov (%p923_p10, %s922_s30), 0  ;;  %p930_p12 = scmp.gt.s32.totalorder %s929_s19, 0 }
  0x2d   : > { %s1387_s17 = scalar_lea.vmem %s1473_s8, %s937_s29  ;;  %s1491_s30 = smov (!%p925_p11, %s1489_s30), 0 }
  0x2e   : > { %s440_s20 = sadd.s32 %s1491_s30, %s1487_s11  ;;  %p455_p13 = scmp.lt.s32.totalorder %s449_s28, 2 }
  0x2f   : > { %s442_s22 = sadd.s32 %s927_s0, %s440_s20  ;;  %s1474_s5 = sld [smem:[#allocation15_spill]] }
  0x30   : > { %s928_s23 = sshll.u32 %s442_s22, 2  ;;  %p470_p0 = scmp.lt.s32.totalorder %s469_s18, 2 }
  0x31   : > { %s1493_s19 = smov (%p930_p12, %s929_s19), 0  ;;  %s1495_s28 = smov (!%p455_p13, %s449_s28), 2 }
  0x32   : > { %s931_s29 = sshll.u32 %s1493_s19, 1  ;;  %p504_p1 = scmp.eq.s32.totalorder %s503_s21, 1 }
  0x33   : > { %p457_p2 = scmp.lt.s32.totalorder %s931_s29, 1  ;;  %s932_s27 = sshll.u32 %s1495_s28, 1  ;;  %v1246_v1 = vmov (%p504_p1), 0.0  }
  0x34   : > { %s1497_s18 = smov (!%p470_p0, %s469_s18), 2  ;;  %p488_p3 = scmp.lt.s32.totalorder %s487_s24, 2  ;;  %509 = vst [vmem:[#allocation3] sm:$0xff] (%p504_p1), %v1246_v1 }
  0x35   : > { %s1396_s1 = scalar_lea.vmem %s1474_s5, %s928_s23  ;;  %s1499_s29 = smov (!%p457_p2, %s931_s29), 1 }
  0x36   : > { %s934_s0 = sshll.u32 %s1497_s18, 1  ;;  %s460_s30 = sadd.s32 %s932_s27, %s1499_s29 }
  0x37   : > { %s475_s4 = sadd.s32 %s934_s0, %s1487_s11  ;;  %s933_s16 = sshll.u32 %s460_s30, 2 }
  0x38   : > { %s935_s20 = sshll.u32 %s475_s4, 2  ;;  %s462_s23 = scalar_lea.vmem %s1457_s6, %s933_s16 }
  0x39   : > { %s1405_s19 = scalar_lea.vmem %s1458_s7, %s935_s20  ;;  %s1501_s24 = smov (!%p488_p3, %s487_s24), 2 }
  0x3a   : > { %s938_s8 = sshll.u32 %s1501_s24, 1  ;;  %508 = sbr.rel (!%p504_p1) target bundleno = 63 (0x3f), region = 52 }
  0x3b   : > { %s493_s28 = sadd.s32 %s938_s8, %s1487_s11 }
  0x3c   : > { %s939_s9 = sshll.u32 %s493_s28, 2 }
  0x3d   : > { %s1411_s29 = scalar_lea.vmem %s1461_s10, %s939_s9 }
  0x3f PF: > { %s510_s27 = sld [smem:[#allocation9 + %s1219_s2]] }
  0x45   : > { %p942_p4 = scmp.le.s32.totalorder %s510_s27, 0 }
  0x47   : > { %514 = sbr.rel (%p942_p4) target bundleno = 214 (0xd6), region = 56 }
  0x4c   : > { %v1018_v2 = vld [vmem:[%s462_s23] sm:$0xff]  ;;  %vm525_vm0 = vcmask 130048  }
  0x4d   : > { %536 = vmatpush.bf16.msra.mxu0 %v1018_v2  ;;  %v516_v3 = vld [vmem:[%s1396_s1] sm:$0xf] }
  0x4e   : > { %v515_v4 = vld [vmem:[#allocation2] sm:$0xff] }
  0x50   : > { %947 = vmatmul.msk.bf16.vlgmr.msra.gmra.mxu0 %vm525_vm0, %v516_v3 }
  0xcd   : > { %v538_v5 = vpop.f32.mrf.mxu0 }
  0xce   : > { %v542_v6 = vadd.f32 %v538_v5, %v515_v4 }
  0xd0   : > { %543 = vst [vmem:[#allocation2] sm:$0xff] %v542_v6 }
  0xd5   : > { %v540_v7 = vpop.f32.mrf.mxu0 }
  0xd6 PF: > { %v548_v8 = vld [vmem:[%s1387_s17] sm:$0xff]  ;;  %s1019_s5 = sshll.u32 %s1219_s2, 7  ;;  %v1247_v9 = vmov 0   ;;  %s734_s9 = sld [smem:[#allocation8 + %s1219_s2]]  ;;  %v730_v46 = vld [vmem:[#allocation3] sm:$0xff] }
  0xd7   : > { %1098 = vset.pattern.permute.xlu0 %v1247_v9  ;;  %s1418_s8 = scalar_lea.vmem [#allocation10], %s1019_s5  ;;  %v556_v25 = vld [vmem:[%s1405_s19] sm:$0xf] }
  0xd8   : > { %551 = vperm.xlu0 %1098, %v548_v8   ;;  %v1027_v10 = vld [vmem:[%s1418_s8 + $0x38] sm:$0xff]  ;;  %v1026_v12 = vld [vmem:[%s1418_s8 + $0x30] sm:$0xff]  ;;  %v1025_v14 = vld [vmem:[%s1418_s8 + $0x28] sm:$0xff] }
  0xd9   : > { %v1035_v11 = vld [vmem:[%s1418_s8 + $0x78] sm:$0xff]  ;;  %688 = vmatpush.bf16.msra.mxu0 %v1027_v10  ;;  %v1034_v13 = vld [vmem:[%s1418_s8 + $0x70] sm:$0xff]  ;;  %v1033_v15 = vld [vmem:[%s1418_s8 + $0x68] sm:$0xff] }
  0xda   : > { %701 = vmatpush.bf16.msra.mxu1 %v1035_v11  ;;  %v1024_v16 = vld [vmem:[%s1418_s8 + $0x20] sm:$0xff]  ;;  %v1023_v18 = vld [vmem:[%s1418_s8 + $0x18] sm:$0xff]  ;;  %v1022_v20 = vld [vmem:[%s1418_s8 + $0x10] sm:$0xff] }
  0xdb   : > { %v1032_v17 = vld [vmem:[%s1418_s8 + $0x60] sm:$0xff]  ;;  %v1031_v19 = vld [vmem:[%s1418_s8 + $0x58] sm:$0xff]  ;;  %v1030_v21 = vld [vmem:[%s1418_s8 + $0x50] sm:$0xff] }
  0xdc   : > { %v1021_v22 = vld [vmem:[%s1418_s8 + $0x8] sm:$0xff]  ;;  %v1020_v24 = vld [vmem:[%s1418_s8] sm:$0xff]  ;;  %p735_p5 = scmp.eq.s32.totalorder %s734_s9, 1 }
  0xdd   : > { %689 = vmatpush.bf16.msra.mxu0 %v1026_v12  ;;  %v1029_v23 = vld [vmem:[%s1418_s8 + $0x48] sm:$0xff]  ;;  %v1028_v26 = vld [vmem:[%s1418_s8 + $0x40] sm:$0xff] }
  0xde   : > { %702 = vmatpush.bf16.msra.mxu1 %v1034_v13  ;;  %v547_v27 = vld [vmem:[#allocation2] sm:$0xff] }
  0xe1   : > { %690 = vmatpush.bf16.msra.mxu0 %v1025_v14 }
  0xe2   : > { %703 = vmatpush.bf16.msra.mxu1 %v1033_v15 }
  0xe5   : > { %691 = vmatpush.bf16.msra.mxu0 %v1024_v16 }
  0xe6   : > { %704 = vmatpush.bf16.msra.mxu1 %v1032_v17 }
  0xe9   : > { %692 = vmatpush.bf16.msra.mxu0 %v1023_v18 }
  0xea   : > { %705 = vmatpush.bf16.msra.mxu1 %v1031_v19 }
  0xed   : > { %693 = vmatpush.bf16.msra.mxu0 %v1022_v20 }
  0xee   : > { %706 = vmatpush.bf16.msra.mxu1 %v1030_v21 }
  0xf1   : > { %694 = vmatpush.bf16.msra.mxu0 %v1021_v22 }
  0xf2   : > { %707 = vmatpush.bf16.msra.mxu1 %v1029_v23 }
  0xf5   : > { %695 = vmatpush.bf16.msra.mxu0 %v1020_v24 }
  0xf6   : > { %708 = vmatpush.bf16.msra.mxu1 %v1028_v26 }
  0xf8   : > { %696 = vmatmul.bf16.vlgmr.msra.gmra.mxu0 %v556_v25 }
 0x14a   : > { %v552_v28 = vpop.permute.xlu0 %551 }
 0x14b   : > { %v554_v29 = vmul.f32 %v552_v28, %v547_v27 }
 0x14d   : > { %v555_v30 = vpack.c.bf16 %v554_v29, %v554_v29 }
 0x14f   : > { %709 = vmatmul.bf16.vlgmr.msra.gmra.mxu1 %v555_v30 }
 0x175   : > { %v697_v31 = vpop.f32.mrf.mxu0 }
 0x17d   : > { %v699_v32 = vpop.f32.mrf.mxu0 }
 0x1cc   : > { %v710_v33 = vpop.f32.mrf.mxu1 }
 0x1cd   : > { %v711_v34 = vadd.f32 %v710_v33, %v697_v31 }
 0x1cf   : > { %v714_v35 = vmax.f32 %v711_v34, 0.0 }
 0x1d1   : > { %v715_v36 = vmul.f32 %v714_v35, %v714_v35 }
 0x1d3   : > { %716 = vadd.xlane.f32.xlu0 %v715_v36 }
 0x1d4   : > { %v712_v37 = vpop.f32.mrf.mxu1 }
 0x246   : > { %v717_v38 = vpop.xlane.xlu0 %716 }
 0x247   : > { %1099 = vrsqrt.f32 %v717_v38  ;;  %vm725_vm2 = vweird.f32 %v717_v38  ;;  %vm718_vm4 = vcmp.gt.f32.partialorder %v717_v38, 0.0 }
 0x24d   : > { %v1100_v39 = vpop.eup %1099 }
 0x24e   : > { %v720_v40 = vmul.f32 %v1100_v39, %v717_v38  ;;  %vm726_vm1 = vweird.f32 %v1100_v39 }
 0x24f   : > { %vm727_vm3 = vmor %vm725_vm2, %vm726_vm1 }
 0x250   : > { %v721_v41 = vmul.f32 %v1100_v39, %v720_v40 }
 0x252   : > { %v722_v42 = vmul.f32 0.5, %v721_v41 }
 0x254   : > { %v723_v43 = vsub.f32 1.5, %v722_v42 }
 0x256   : > { %v724_v44 = vmul.f32 %v1100_v39, %v723_v43 }
 0x258   : > { %v728_v45 = vsel %vm727_vm3, %v1100_v39, %v724_v44 }
 0x259   : > { %v729_v47 = vsel %vm718_vm4, %v728_v45, 1.0 }
 0x25a   : > { %v731_v48 = vmul.f32 %v729_v47, %v714_v35  ;;  %739 = sbr.rel (!%p735_p5) target bundleno = 617 (0x269), region = 64 }
 0x25c   : > { %v732_v49 = vadd.f32 %v731_v48, %v730_v46 }
 0x25e   : > { %733 = vst [vmem:[#allocation3] sm:$0xff] %v732_v49 }
 0x265   : > { %v740_v50 = vld [vmem:[#allocation3] sm:$0xff] }
 0x266   : > { %v741_v51 = vpack.c.bf16 %v740_v50, %v740_v50 }
 0x268   : > { %742 = vst [vmem:[%s1411_s29] sm:$0xf] %v741_v51 }
 0x269 PF: > { %s49_s13 = sadd.s32 1, %s1235_s13   ;;  %s1475_s15 = sld [smem:[#allocation14_spill]] }
 0x26a   : > { %p46_p6 = scmp.ge.s32.totalorder %s49_s13, 10   ;;  %s1476_s2 = smov %s1227_s3 }
 0x26b   : > { %s1477_s11 = smov %s1231_s12  ;;  %s1478_s3 = smov %s1481_s14 }
 0x26c   :  { %48 = sbr.rel (!%p46_p6) target bundleno = 18 (0x12), region = 105 }
 0x26f   : > { %s1479_s12 = smov %s1475_s15 }
 0x271   :  { %773 = vsyncpa [#allocation11], 1 }
 0x272   :  { %775 = vsyncpa [#allocation11 + $0x1], 1 }

// kernel: gnn_forward.4
= control target key start
LH: loop header
LB: loop body
LE: loop exit
PB: predicated region body
PF: predicated region fallthrough
CT: control target
= control target key end

     0   :  { %s1385_s0 = inlined_call_operand.hbm [shape: bf16[3,16,128], index: 0, kind: input, shape index: {}]   ;;  %s1386_s1 = inlined_call_operand.hbm [shape: bf16[3,128,128], index: 1, kind: input, shape index: {}]   ;;  %s1387_s2 = inlined_call_operand.vmem [shape: f32[3,1,128], index: 2, kind: input, shape index: {}]   ;;  %s1388_s3 = inlined_call_operand.hbm [shape: bf16[3,128,128], index: 3, kind: input, shape index: {}]   ;;  %s1389_s4 = inlined_call_operand.vmem [shape: f32[3,1,128], index: 4, kind: input, shape index: {}]   ;;  %s1390_s5 = inlined_call_operand.vmem [shape: bf16[3,16,128], index: 5, kind: output, shape index: {}]  }
   0x1   :  { %1402 = sst [smem:[#allocation15_spill]] %s1386_s1 }
   0x2   :  { %1403 = sst [smem:[#allocation16_spill]] %s1387_s2 }
   0x3   :  { %1404 = sst [smem:[#allocation17_spill]] %s1388_s3 }
   0x4   :  { %1405 = sst [smem:[#allocation18_spill]] %s1389_s4 }
   0x5   :  { %1406 = sst [smem:[#allocation19_spill]] %s1390_s5 }
   0x6   :  { %10 = vsyncpa [#allocation3], 0 }
   0x7   :  { %12 = vsyncpa [#allocation3 + $0x1], 0 }
   0x8   :  { %13 = vsyncpa [#allocation5], 0 }
   0x9   :  { %15 = vsyncpa [#allocation5 + $0x1], 0  ;;  %s1131_s18 = smov 0   ;;  %s1133_s19 = smov 0  }
   0xa   :  { %s1135_s20 = smov 0   ;;  %s1137_s21 = smov 0  }
   0xb   :  { %s1139_s22 = smov 0   ;;  %s1141_s23 = smov 0  }
   0xc   :  { %s1143_s24 = smov 0   ;;  %s1145_s25 = smov 0  }
   0xd   :  { %s1147_s26 = smov 0   ;;  %s1149_s27 = smov 0  }
   0xe   :  { %s1151_s28 = smov 0  }
   0xf LB: > { %1407 = sst [smem:[#allocation9_spill]] %s1061_s19  ;;  %p50_p0 = scmp.eq.s32.totalorder %s1097_s28, 0  ;;  %s1097_s28 = sphi %s1151_s28, %s21_s28   ;;  %s1093_s27 = sphi %s1149_s27, %s1443_s27   ;;  %s1089_s26 = sphi %s1147_s26, %s1442_s26   ;;  %s1085_s25 = sphi %s1145_s25, %s1441_s25   ;;  %s1081_s24 = sphi %s1143_s24, %s1440_s24   ;;  %s1077_s23 = sphi %s1141_s23, %s1439_s23   ;;  %s1073_s22 = sphi %s1139_s22, %s1438_s22   ;;  %s1069_s21 = sphi %s1137_s21, %s1437_s21   ;;  %s1065_s20 = sphi %s1135_s20, %s1436_s20   ;;  %s1061_s19 = sphi %s1133_s19, %s1435_s19   ;;  %s1057_s18 = sphi %s1131_s18, %s1432_s18  }
  0x10   : > { %1408 = sst [smem:[#allocation10_spill]] %s1081_s24  ;;  %p75_p1 = scmp.ne.s32.totalorder %s1065_s20, %s1061_s19 }
  0x11   : > { %1409 = sst [smem:[#allocation11_spill]] %s1085_s25  ;;  %p820_p2 = scmp.lt.s32.totalorder %s1097_s28, 6 }
  0x12   : > { %p77_p3 = por %p75_p1, %p50_p0  ;;  %s232_s30 = sand.u32 1, %s1097_s28  }
  0x13   : > { %s234_s6 = sand.u32 1, %s1065_s20   ;;  %s786_s8 = sshll.u32 %s1093_s27, 6 }
  0x14   : > { %s708_s7 = sshll.u32 %s234_s6, 6  ;;  %s1410_s1 = sld [smem:[#allocation15_spill]] }
  0x15   : > { %s236_s13 = scalar_lea.vmem [#allocation4], %s708_s7  ;;  %p1201_p4 = pnand %p820_p2, %p77_p3 }
  0x16   : > { %s244_s14 = sshll.u32 %s236_s13, 4  ;;  %s1412_s3 = sld [smem:[#allocation17_spill]]  ;;  %s245_s14 = int_to_ptr.vmem [resolvable:$true] %s244_s14 }
  0x17   : > { %s1208_s9 = scalar_lea.sflag [#allocation5], %s232_s30  ;;  %s1391_s10 = smov 64  }
  0x18   : > { %p81_p5 = scmp.ne.s32.totalorder %s1061_s19, %s1057_s18  ;;  %s264_s30 = scalar_lea.vmem [#allocation6], %s708_s7 }
  0x19   : > { %p714_p6 = scmp.ge.s32.totalorder %s1097_s28, 1  ;;  %p286_p7 = scmp.lt.s32.totalorder %s1097_s28, 7 }
  0x1a   : > { %s241_s11 = scalar_lea.hbm %s1410_s1, %s786_s8  ;;  %s33_s17 = sadd.s32 1, %s1093_s27 }
  0x1b   : > { %s242_s12 = sshll.u32 %s241_s11, 4  ;;  %s1392_s11 = smov 4   ;;  %s243_s12 = int_to_ptr.hbm [resolvable:$true] %s242_s12 }
  0x1c   : > { %s269_s6 = scalar_lea.hbm %s1412_s3, %s786_s8  ;;  %s1220_s8 = sshll.u32 %s264_s30, 4  ;;  %s273_s8 = int_to_ptr.vmem [resolvable:$true] %s1220_s8 }
  0x1d   : > { %816 = dma.hbm_to_vmem [thread:$0]  (!%p1201_p4), %s243_s12, 1024, %s245_s14, %s1208_s9, %s1391_s10, %s1391_s10, %s1392_s11  }
  0x1e   : > { %s270_s13 = sshll.u32 %s269_s6, 4  ;;  %p1224_p8 = pnand %p714_p6, %p286_p7  ;;  %s1218_s13 = int_to_ptr.hbm [resolvable:$true] %s270_s13 }
  0x1f   : > { %s1393_s12 = sadd.s32 4294967295, %s1097_s28   ;;  %s30_s14 = sadd.s32 1, %s1089_s26 }
  0x20   : > { %p31_p9 = scmp.ge.s32.totalorder %s30_s14, 2  ;;  %s42_s6 = sadd.s32 1, %s1077_s23 }
  0x21   : > { %p49_p10 = scmp.ne.s32.totalorder %s1077_s23, %s1073_s22  ;;  %p55_p11 = scmp.ne.s32.totalorder %s1073_s22, %s1069_s21 }
  0x22   : > { %s1445_s14 = smov (%p31_p9, %s30_s14), 0  ;;  %s1447_s17 = smov (!%p31_p9, %s33_s17), %s1093_s27 }
  0x23   : > { %1414 = sst [smem:[#allocation12_spill]] %s1445_s14  ;;  %s38_s7 = ssub.s32 %s1089_s26, %s1445_s14 }
  0x24   : > { %p1243_p12 = por %p50_p0, %p49_p10  ;;  %p35_p13 = scmp.ge.s32.totalorder %s1447_s17, 3 }
  0x25   : > { %p56_p1 = scmp.eq.s32.totalorder %s1393_s12, 0  ;;  %s211_s10 = sand.u32 1, %s1077_s23  }
  0x26   : > { %s706_s11 = sshll.u32 %s1093_s27, 1  ;;  %s1449_s17 = smov (%p35_p13, %s1447_s17), 0 }
  0x27   : > { %1416 = sst [smem:[#allocation13_spill]] %s1449_s17  ;;  %p1253_p3 = por %p56_p1, %p55_p11 }
  0x28   : > { %p1260_p6 = por %p81_p5, %p56_p1  ;;  %s37_s1 = ssub.s32 %s1093_s27, %s1449_s17 }
  0x29   : > { %s39_s3 = sor.u32 %s38_s7, %s37_s1  ;;  %p66_p0 = scmp.eq.s32.totalorder %s37_s1, 0 }
  0x2a   : > { %s1418_s29 = scalar_select %p1260_p6, 1, 0 }
  0x2b   : > { %p40_p7 = scmp.eq.s32.totalorder %s39_s3, 0  ;;  %s705_s12 = sshll.u32 %s211_s10, 2 }
  0x2c   : > { %1419 = sst [smem:[#allocation14_spill]] %s1418_s29  ;;  %s1420_s14 = sadd.s32 1, %s1065_s20 }
  0x2d   : > { %s1269_s5 = scalar_select %p66_p0, %s1065_s20, %s1420_s14  }
  0x2e   : > { %s1272_s4 = scalar_select %p40_p7, %s1077_s23, %s42_s6  }
  0x2f   : > { %s219_s18 = sadd.s32 %s1089_s26, %s706_s11  ;;  %s215_s2 = scalar_lea.vmem [#allocation2], %s705_s12 }
  0x30   : > { %s707_s24 = sshll.u32 %s219_s18, 2  ;;  %s225_s25 = sshll.u32 %s215_s2, 4  ;;  %s226_s25 = int_to_ptr.vmem [resolvable:$true] %s225_s25 }
  0x31   : > { %s221_s17 = scalar_lea.hbm %s1385_s0, %s707_s24  ;;  %p811_p5 = pnand %p820_p2, %p1243_p12 }
  0x32   : > { %s223_s1 = sshll.u32 %s221_s17, 4  ;;  %s212_s3 = scalar_lea.sflag [#allocation3], %s211_s10  ;;  %s224_s1 = int_to_ptr.hbm [resolvable:$true] %s223_s1 }
  0x33   : > { %813 = dma.hbm_to_vmem [thread:$0]  (!%p811_p5), %s224_s1, 64, %s226_s25, %s212_s3  }
  0x34   : > { %s1421_s14 = smov 4   ;;  %s1422_s6 = smov 64  }
  0x35   : > { %819 = dma.hbm_to_vmem [thread:$0]  (!%p1201_p4), %s1218_s13, 1024, %s273_s8, %s1208_s9, %s1422_s6, %s1422_s6, %s1421_s14  }
  0x36   : > { %290 = sbr.rel (%p1224_p8) target bundleno = 366 (0x16e), region = 40  ;;  %s292_s2 = sand.u32 (!%p1224_p8), 1, %s1073_s22  }
  0x37   : > { %s1293_s19 = sshll.u32 (!%p1224_p8), %s292_s2, 2  ;;  %s293_s24 = scalar_lea.sflag (!%p1224_p8), [#allocation3], %s292_s2 }
  0x38   : > { %s296_s29 = scalar_lea.vmem (!%p1224_p8), [#allocation2], %s1293_s19 }
  0x3b   : > { %1048 = dma.done.wait (%p1253_p3), %s293_s24, 64  }
  0x3c   : > { %1050 = vsyncadd (%p1253_p3), %s293_s24, 4294967232  ;;  %s1423_s25 = sadd.s32 4294967295, %s1097_s28   ;;  %s1424_s15 = sld [smem:[#allocation9_spill]] }
  0x3d   : > { %s302_s10 = sand.u32 1, %s1423_s25  }
  0x3e   : > { %s303_s8 = scalar_lea.sflag [#allocation5], %s302_s10 }
  0x42   : > { %s304_s11 = sand.u32 1, %s1424_s15  }
  0x43   : > { %s716_s13 = sshll.u32 %s304_s11, 6 }
  0x44   : > { %s1303_s16 = scalar_lea.vmem [#allocation4], %s716_s13 }
  0x45   : > { %1052 = dma.done.wait (%p1260_p6), %s303_s8, 2048  }
  0x46   : > { %1054 = vsyncadd (%p1260_p6), %s303_s8, 4294965248  ;;  %s1426_s12 = sld [smem:[#allocation11_spill]]  ;;  %v795_v0 = vld [vmem:[%s1303_s16 + $0x38] sm:$0xff]  ;;  %v794_v1 = vld [vmem:[%s1303_s16 + $0x30] sm:$0xff]  ;;  %s1315_s17 = scalar_lea.vmem [#allocation6], %s716_s13 }
  0x47   : > { %446 = vmatpush.bf16.msra.mxu0 %v795_v0  ;;  %v803_v2 = vld [vmem:[%s1315_s17 + $0x38] sm:$0xff]  ;;  %s1427_s21 = sld [smem:[#allocation16_spill]]  ;;  %v802_v3 = vld [vmem:[%s1315_s17 + $0x30] sm:$0xff]  ;;  %v793_v4 = vld [vmem:[%s1303_s16 + $0x28] sm:$0xff] }
  0x48   : > { %528 = vmatpush.bf16.msra.mxu1 %v803_v2  ;;  %v801_v5 = vld [vmem:[%s1315_s17 + $0x28] sm:$0xff]  ;;  %v792_v6 = vld [vmem:[%s1303_s16 + $0x20] sm:$0xff]  ;;  %v791_v8 = vld [vmem:[%s1303_s16 + $0x18] sm:$0xff]  ;;  %s1429_s3 = sld [smem:[#allocation10_spill]] }
  0x49   : > { %v800_v7 = vld [vmem:[%s1315_s17 + $0x20] sm:$0xff]  ;;  %v799_v9 = vld [vmem:[%s1315_s17 + $0x18] sm:$0xff]  ;;  %v790_v10 = vld [vmem:[%s1303_s16 + $0x10] sm:$0xff]  ;;  %s1430_s2 = sld [smem:[#allocation18_spill]] }
  0x4a   : > { %v798_v11 = vld [vmem:[%s1315_s17 + $0x10] sm:$0xff]  ;;  %v789_v12 = vld [vmem:[%s1303_s16 + $0x8] sm:$0xff]  ;;  %v788_v14 = vld [vmem:[%s1303_s16] sm:$0xff]  ;;  %s1431_s13 = sld [smem:[#allocation19_spill]] }
  0x4b   : > { %447 = vmatpush.bf16.msra.mxu0 %v794_v1  ;;  %v797_v13 = vld [vmem:[%s1315_s17 + $0x8] sm:$0xff]  ;;  %v377_v15 = vld [vmem:[%s296_s29] sm:$0xf]  ;;  %v796_v16 = vld [vmem:[%s1315_s17] sm:$0xff] }
  0x4c   : > { %p363_p2 = scmp.lt.s32.totalorder %s1426_s12, 2  ;;  %529 = vmatpush.bf16.msra.mxu1 %v802_v3 }
  0x4e   : > { %s1451_s12 = smov (!%p363_p2, %s1426_s12), 2  ;;  %p371_p4 = scmp.lt.s32.totalorder %s1429_s3, 1 }
  0x4f   : > { %s365_s18 = scalar_lea.vmem %s1427_s21, %s1451_s12  ;;  %448 = vmatpush.bf16.msra.mxu0 %v793_v4  ;;  %s368_s24 = scalar_lea.vmem %s1430_s2, %s1451_s12 }
  0x50   : > { %530 = vmatpush.bf16.msra.mxu1 %v801_v5  ;;  %v911_v17 = vld [vmem:[%s365_s18] ss:$0 sm:$0xff]  ;;  %s1453_s3 = smov (!%p371_p4, %s1429_s3), 1  ;;  %s718_s19 = sshll.u32 %s1451_s12, 1 }
  0x51   : > { %v912_v22 = vld [vmem:[%s368_s24] ss:$0 sm:$0xff]  ;;  %s374_s29 = sadd.s32 %s718_s19, %s1453_s3 }
  0x52   : > { %s719_s9 = sshll.u32 %s374_s29, 2 }
  0x53   : > { %449 = vmatpush.bf16.msra.mxu0 %v792_v6  ;;  %s376_s8 = scalar_lea.vmem %s1431_s13, %s719_s9 }
  0x54   : > { %531 = vmatpush.bf16.msra.mxu1 %v800_v7 }
  0x57   : > { %450 = vmatpush.bf16.msra.mxu0 %v791_v8 }
  0x58   : > { %532 = vmatpush.bf16.msra.mxu1 %v799_v9 }
  0x5b   : > { %451 = vmatpush.bf16.msra.mxu0 %v790_v10 }
  0x5c   : > { %533 = vmatpush.bf16.msra.mxu1 %v798_v11 }
  0x5f   : > { %452 = vmatpush.bf16.msra.mxu0 %v789_v12 }
  0x60   : > { %534 = vmatpush.bf16.msra.mxu1 %v797_v13 }
  0x63   : > { %453 = vmatpush.bf16.msra.mxu0 %v788_v14 }
  0x64   : > { %535 = vmatpush.bf16.msra.mxu1 %v796_v16 }
  0x66   : > { %454 = vmatmul.bf16.vlgmr.msra.gmra.mxu0 %v377_v15 }
  0xe3   : > { %v455_v18 = vpop.f32.mrf.mxu0 }
  0xe4   : > { %v456_v19 = vadd.f32 %v911_v17, %v455_v18 }
  0xe6   : > { %v459_v20 = vpack.c.bf16 %v456_v19, %v456_v19 }
  0xe8   : > { %536 = vmatmul.bf16.vlgmr.msra.gmra.mxu1 %v459_v20 }
  0xeb   : > { %v457_v21 = vpop.f32.mrf.mxu0 }
 0x165   : > { %v537_v23 = vpop.f32.mrf.mxu1 }
 0x166   : > { %v538_v24 = vadd.f32 %v912_v22, %v537_v23 }
 0x168   : > { %vm541_vm0 = vcmp.ge.f32.partialorder %v538_v24, 0.0  ;;  %v542_v25 = vmul.f32 0.01, %v538_v24 }
 0x16a   : > { %v543_v26 = vsel %vm541_vm0, %v538_v24, %v542_v25 }
 0x16b   : > { %v544_v27 = vpack.c.bf16 %v543_v26, %v543_v26 }
 0x16d   : > { %545 = vst [vmem:[%s376_s8] sm:$0xf] %v544_v27  ;;  %v539_v28 = vpop.f32.mrf.mxu1 }
 0x16e PF: > { %s21_s28 = sadd.s32 1, %s1097_s28   ;;  %s1432_s18 = sld [smem:[#allocation9_spill]] }
 0x16f   : > { %p18_p8 = scmp.ge.s32.totalorder %s21_s28, 8   ;;  %s1433_s16 = sld [smem:[#allocation12_spill]] }
 0x170   : > { %s1434_s12 = sld [smem:[#allocation13_spill]]  ;;  %s1435_s19 = smov %s1065_s20 }
 0x171   : > { %s1436_s20 = smov %s1269_s5  ;;  %s1437_s21 = smov %s1073_s22 }
 0x172   : > { %s1438_s22 = smov %s1077_s23  ;;  %s1439_s23 = smov %s1272_s4 }
 0x173   : > { %s1440_s24 = smov %s1089_s26  ;;  %s1441_s25 = smov %s1093_s27 }
 0x174   :  { %20 = sbr.rel (!%p18_p8) target bundleno = 15 (0xf), region = 110 }
 0x175   : > { %s1442_s26 = smov %s1433_s16 }
 0x176   : > { %s1443_s27 = smov %s1434_s12 }
 0x179   :  { %573 = vsyncpa [#allocation3], 1 }
 0x17a   :  { %575 = vsyncpa [#allocation3 + $0x1], 1 }
 0x17b   :  { %576 = vsyncpa [#allocation5], 1 }
 0x17c   :  { %578 = vsyncpa [#allocation5 + $0x1], 1 }

// kernel: gnn_forward.7
= control target key start
LH: loop header
LB: loop body
LE: loop exit
PB: predicated region body
PF: predicated region fallthrough
CT: control target
= control target key end

     0   :  { %s1120_s27 = smov 0   ;;  %s1249_s0 = inlined_call_operand.vmem [shape: bf16[64,128], index: 0, kind: input, shape index: {}]   ;;  %s1250_s1 = inlined_call_operand.vmem [shape: bf16[64,128], index: 1, kind: input, shape index: {}]   ;;  %s1251_s2 = inlined_call_operand.vmem [shape: bf16[256,128], index: 2, kind: input, shape index: {}]   ;;  %s1252_s3 = inlined_call_operand.vmem [shape: f32[1,128], index: 3, kind: input, shape index: {}]   ;;  %s1253_s4 = inlined_call_operand.vmem [shape: bf16[128,128], index: 4, kind: input, shape index: {}]   ;;  %s1254_s5 = inlined_call_operand.vmem [shape: f32[1,128], index: 5, kind: input, shape index: {}]   ;;  %s1255_s6 = inlined_call_operand.vmem [shape: bf16[128,128], index: 6, kind: input, shape index: {}]   ;;  %s1256_s7 = inlined_call_operand.vmem [shape: f32[1,128], index: 7, kind: input, shape index: {}]   ;;  %s1257_s8 = inlined_call_operand.vmem [shape: f32[64,128], index: 8, kind: output, shape index: {}]  }
   0x1 LB: > { %s839_s28 = sadd.s32 4294967295, %s1073_s27   ;;  %p843_p0 = scmp.ge.s32.totalorder %s1073_s27, 1  ;;  %s1073_s27 = sphi %s1120_s27, %s18_s27  }
   0x2   : > { %p274_p1 = scmp.lt.s32.totalorder %s1073_s27, 3 }
   0x4   : > { %p275_p2 = pnand %p843_p0, %p274_p1 }
   0x5   : > { %s844_s23 = sshll.u32 (!%p275_p2), %s839_s28, 2 }
   0x6   : > { %278 = sbr.rel (%p275_p2) target bundleno = 518 (0x206), region = 52  ;;  %p314_p3 = scmp.lt.s32.totalorder (!%p275_p2), %s844_s23, 7 }
   0xb   : > { %v1015_v0 = vld [vmem:[%s1251_s2 + $0x38] sm:$0xff]  ;;  %v1014_v2 = vld [vmem:[%s1251_s2 + $0x30] sm:$0xff]  ;;  %v1013_v4 = vld [vmem:[%s1251_s2 + $0x28] sm:$0xff]  ;;  %s1259_s23 = smov (!%p314_p3, %s844_s23), 7 }
   0xc   : > { %v1023_v1 = vld [vmem:[%s1251_s2 + $0x78] sm:$0xff]  ;;  %495 = vmatpush.bf16.msra.mxu0 %v1015_v0  ;;  %v1022_v3 = vld [vmem:[%s1251_s2 + $0x70] sm:$0xff]  ;;  %v1021_v5 = vld [vmem:[%s1251_s2 + $0x68] sm:$0xff]  ;;  %s845_s15 = sshll.u32 %s1259_s23, 2 }
   0xd   : > { %514 = vmatpush.bf16.msra.mxu1 %v1023_v1  ;;  %v1012_v6 = vld [vmem:[%s1251_s2 + $0x20] sm:$0xff]  ;;  %v1011_v8 = vld [vmem:[%s1251_s2 + $0x18] sm:$0xff]  ;;  %v1010_v10 = vld [vmem:[%s1251_s2 + $0x10] sm:$0xff]  ;;  %s317_s22 = scalar_lea.vmem %s1249_s0, %s845_s15  ;;  %s323_s26 = scalar_lea.vmem %s1250_s1, %s845_s15 }
   0xe   : > { %v1020_v7 = vld [vmem:[%s1251_s2 + $0x60] sm:$0xff]  ;;  %v1019_v9 = vld [vmem:[%s1251_s2 + $0x58] sm:$0xff]  ;;  %v1018_v11 = vld [vmem:[%s1251_s2 + $0x50] sm:$0xff] }
   0xf   : > { %v1009_v12 = vld [vmem:[%s1251_s2 + $0x8] sm:$0xff]  ;;  %v1008_v14 = vld [vmem:[%s1251_s2] sm:$0xff]  ;;  %v1031_v20 = vld [vmem:[%s1253_s4 + $0x38] sm:$0xff] }
  0x10   : > { %496 = vmatpush.bf16.msra.mxu0 %v1014_v2  ;;  %v1017_v13 = vld [vmem:[%s1251_s2 + $0x48] sm:$0xff]  ;;  %v1016_v15 = vld [vmem:[%s1251_s2 + $0x40] sm:$0xff]  ;;  %631 = vmatpush.bf16.msra.mxu2 %v1031_v20  ;;  %v1030_v21 = vld [vmem:[%s1253_s4 + $0x30] sm:$0xff] }
  0x11   : > { %515 = vmatpush.bf16.msra.mxu1 %v1022_v3  ;;  %v1004_v16 = vld [vmem:[%s317_s22] sm:$0xff]  ;;  %v1005_v18 = vld [vmem:[%s317_s22 + $0x8] sm:$0xff]  ;;  %v1027_v24 = vld [vmem:[%s1253_s4 + $0x18] sm:$0xff]  ;;  %s849_s22 = sshll.u32 %s1259_s23, 3 }
  0x12   : > { %v1006_v17 = vld [vmem:[%s323_s26] sm:$0xff]  ;;  %v1007_v19 = vld [vmem:[%s323_s26 + $0x8] sm:$0xff]  ;;  %v1026_v25 = vld [vmem:[%s1253_s4 + $0x10] sm:$0xff]  ;;  %s329_s30 = scalar_lea.vmem %s1257_s8, %s849_s22 }
  0x13   : > { %v1029_v22 = vld [vmem:[%s1253_s4 + $0x28] sm:$0xff]  ;;  %v1028_v23 = vld [vmem:[%s1253_s4 + $0x20] sm:$0xff]  ;;  %v1039_v40 = vld [vmem:[%s1255_s6 + $0x38] sm:$0xff] }
  0x14   : > { %497 = vmatpush.bf16.msra.mxu0 %v1013_v4  ;;  %632 = vmatpush.bf16.msra.mxu2 %v1030_v21  ;;  %v1025_v26 = vld [vmem:[%s1253_s4 + $0x8] sm:$0xff]  ;;  %v1024_v27 = vld [vmem:[%s1253_s4] sm:$0xff] }
  0x15   : > { %516 = vmatpush.bf16.msra.mxu1 %v1021_v5  ;;  %v1048_v28 = vld [vmem:[%s1252_s3] ss:$0 sm:$0xff]  ;;  %748 = vmatpush.bf16.msra.mxu3 %v1039_v40 }
  0x18   : > { %498 = vmatpush.bf16.msra.mxu0 %v1012_v6  ;;  %633 = vmatpush.bf16.msra.mxu2 %v1029_v22 }
  0x19   : > { %517 = vmatpush.bf16.msra.mxu1 %v1020_v7 }
  0x1c   : > { %499 = vmatpush.bf16.msra.mxu0 %v1011_v8  ;;  %634 = vmatpush.bf16.msra.mxu2 %v1028_v23  ;;  %v1038_v8 = vld [vmem:[%s1255_s6 + $0x30] sm:$0xff] }
  0x1d   : > { %518 = vmatpush.bf16.msra.mxu1 %v1019_v9  ;;  %749 = vmatpush.bf16.msra.mxu3 %v1038_v8  ;;  %v1037_v9 = vld [vmem:[%s1255_s6 + $0x28] sm:$0xff] }
  0x20   : > { %500 = vmatpush.bf16.msra.mxu0 %v1010_v10  ;;  %635 = vmatpush.bf16.msra.mxu2 %v1027_v24  ;;  %v1036_v10 = vld [vmem:[%s1255_s6 + $0x20] sm:$0xff] }
  0x21   : > { %519 = vmatpush.bf16.msra.mxu1 %v1018_v11  ;;  %750 = vmatpush.bf16.msra.mxu3 %v1037_v9  ;;  %v1035_v11 = vld [vmem:[%s1255_s6 + $0x18] sm:$0xff] }
  0x24   : > { %501 = vmatpush.bf16.msra.mxu0 %v1009_v12  ;;  %636 = vmatpush.bf16.msra.mxu2 %v1026_v25  ;;  %v1034_v12 = vld [vmem:[%s1255_s6 + $0x10] sm:$0xff] }
  0x25   : > { %520 = vmatpush.bf16.msra.mxu1 %v1017_v13  ;;  %751 = vmatpush.bf16.msra.mxu3 %v1036_v10  ;;  %v1033_v13 = vld [vmem:[%s1255_s6 + $0x8] sm:$0xff] }
  0x28   : > { %502 = vmatpush.bf16.msra.mxu0 %v1008_v14  ;;  %637 = vmatpush.bf16.msra.mxu2 %v1025_v26  ;;  %v1032_v14 = vld [vmem:[%s1255_s6] sm:$0xff] }
  0x29   : > { %521 = vmatpush.bf16.msra.mxu1 %v1016_v15  ;;  %752 = vmatpush.bf16.msra.mxu3 %v1035_v11  ;;  %v1049_v15 = vld [vmem:[%s1254_s5] ss:$0 sm:$0xff] }
  0x2b   : > { %503 = vmatmul.bf16.vlgmr.msra.gmra.mxu0 %v1004_v16 }
  0x2c   : > { %522 = vmatmul.bf16.vlgmr.msra.gmra.mxu1 %v1006_v17  ;;  %638 = vmatpush.bf16.msra.mxu2 %v1024_v27 }
  0x2d   : > { %753 = vmatpush.bf16.msra.mxu3 %v1034_v12 }
  0x31   : > { %754 = vmatpush.bf16.msra.mxu3 %v1033_v13 }
  0x35   : > { %755 = vmatpush.bf16.msra.mxu3 %v1032_v14 }
  0x3b   : > { %508 = vmatmul.bf16.gmra.mxu0 %v1005_v18 }
  0x3c   : > { %527 = vmatmul.bf16.gmra.mxu1 %v1007_v19 }
  0xa8   : > { %v504_v29 = vpop.f32.mrf.mxu0 }
  0xa9   : > { %v523_v30 = vpop.f32.mrf.mxu1  ;;  %v505_v31 = vadd.f32 %v1048_v28, %v504_v29 }
  0xab   : > { %v524_v32 = vadd.f32 %v523_v30, %v505_v31 }
  0xad   : > { %v537_v33 = vmul.f32 1.442695, %v524_v32  ;;  %vm533_vm0 = vcmp.gt.f32.partialorder %v524_v32, 0.0 }
  0xaf   : > { %1051 = vpow2.f32 %v537_v33 }
  0xb0   : > { %v506_v34 = vpop.f32.mrf.mxu0 }
  0xb1   : > { %v525_v35 = vpop.f32.mrf.mxu1  ;;  %v507_v36 = vadd.f32 %v1048_v28, %v506_v34 }
  0xb3   : > { %v526_v37 = vadd.f32 %v525_v35, %v507_v36 }
  0xb5   : > { %v1052_v38 = vpop.eup %1051  ;;  %v539_v39 = vmul.f32 1.442695, %v526_v37  ;;  %vm534_vm1 = vcmp.gt.f32.partialorder %v526_v37, 0.0 }
  0xb6   : > { %v930_v41 = vadd.f32 -1.0, %v1052_v38 }
  0xb7   : > { %1053 = vpow2.f32 %v539_v39 }
  0xb8   : > { %v509_v42 = vpop.f32.mrf.mxu0  ;;  %v549_v46 = vmul.f32 1.6732632, %v930_v41 }
  0xb9   : > { %v528_v43 = vpop.f32.mrf.mxu1  ;;  %v510_v44 = vadd.f32 %v1048_v28, %v509_v42 }
  0xba   : > { %v553_v52 = vsel %vm533_vm0, %v524_v32, %v549_v46 }
  0xbb   : > { %v529_v45 = vadd.f32 %v528_v43, %v510_v44  ;;  %v557_v57 = vmul.f32 1.050701, %v553_v52 }
  0xbd   : > { %v1054_v47 = vpop.eup %1053  ;;  %v541_v48 = vmul.f32 1.442695, %v529_v45  ;;  %vm535_vm2 = vcmp.gt.f32.partialorder %v529_v45, 0.0 }
  0xbe   : > { %v931_v49 = vadd.f32 -1.0, %v1054_v47 }
  0xbf   : > { %1055 = vpow2.f32 %v541_v48 }
  0xc0   : > { %v550_v50 = vmul.f32 1.6732632, %v931_v49  ;;  %v511_v51 = vpop.f32.mrf.mxu0 }
  0xc1   : > { %v512_v53 = vadd.f32 %v1048_v28, %v511_v51  ;;  %v530_v54 = vpop.f32.mrf.mxu1 }
  0xc2   : > { %v554_v55 = vsel %vm534_vm1, %v526_v37, %v550_v50  ;;  %v1050_v50 = vld [vmem:[%s1256_s7] ss:$0 sm:$0xff] }
  0xc3   : > { %v531_v56 = vadd.f32 %v530_v54, %v512_v53  ;;  %v558_v58 = vmul.f32 1.050701, %v554_v55 }
  0xc5   : > { %v1056_v59 = vpop.eup %1055  ;;  %v543_v60 = vmul.f32 1.442695, %v531_v56  ;;  %v561_v61 = vpack.c.bf16 %v558_v58, %v557_v57  ;;  %vm536_vm3 = vcmp.gt.f32.partialorder %v531_v56, 0.0 }
  0xc6   : > { %v932_v62 = vadd.f32 -1.0, %v1056_v59 }
  0xc7   : > { %1057 = vpow2.f32 %v543_v60  ;;  %639 = vmatmul.bf16.vlgmr.msra.gmra.mxu2 %v561_v61 }
  0xc8   : > { %v551_v63 = vmul.f32 1.6732632, %v932_v62 }
  0xca   : > { %v555_v3 = vsel %vm535_vm2, %v529_v45, %v551_v63 }
  0xcb   : > { %v559_v5 = vmul.f32 1.050701, %v555_v3 }
  0xcd   : > { %v1058_v0 = vpop.eup %1057 }
  0xce   : > { %v933_v1 = vadd.f32 -1.0, %v1058_v0 }
  0xd0   : > { %v552_v2 = vmul.f32 1.6732632, %v933_v1 }
  0xd2   : > { %v556_v4 = vsel %vm536_vm3, %v531_v56, %v552_v2 }
  0xd3   : > { %v560_v6 = vmul.f32 1.050701, %v556_v4 }
  0xd5   : > { %v562_v7 = vpack.c.bf16 %v560_v6, %v559_v5 }
  0xd7   : > { %644 = vmatmul.bf16.gmra.mxu2 %v562_v7 }
 0x14a   : > { %v640_v16 = vpop.f32.mrf.mxu2 }
 0x14b   : > { %v641_v17 = vadd.f32 %v1049_v15, %v640_v16 }
 0x14d   : > { %v654_v18 = vmul.f32 1.442695, %v641_v17  ;;  %vm650_vm4 = vcmp.gt.f32.partialorder %v641_v17, 0.0 }
 0x14f   : > { %1059 = vpow2.f32 %v654_v18 }
 0x152   : > { %v642_v19 = vpop.f32.mrf.mxu2 }
 0x153   : > { %v643_v20 = vadd.f32 %v1049_v15, %v642_v19 }
 0x155   : > { %v1060_v21 = vpop.eup %1059  ;;  %v656_v22 = vmul.f32 1.442695, %v643_v20  ;;  %vm651_vm5 = vcmp.gt.f32.partialorder %v643_v20, 0.0 }
 0x156   : > { %v966_v23 = vadd.f32 -1.0, %v1060_v21 }
 0x157   : > { %1061 = vpow2.f32 %v656_v22 }
 0x158   : > { %v666_v26 = vmul.f32 1.6732632, %v966_v23 }
 0x15a   : > { %v645_v24 = vpop.f32.mrf.mxu2  ;;  %v670_v31 = vsel %vm650_vm4, %v641_v17, %v666_v26 }
 0x15b   : > { %v646_v25 = vadd.f32 %v1049_v15, %v645_v24  ;;  %v674_v35 = vmul.f32 1.050701, %v670_v31 }
 0x15d   : > { %v1062_v27 = vpop.eup %1061  ;;  %v658_v28 = vmul.f32 1.442695, %v646_v25  ;;  %vm652_vm6 = vcmp.gt.f32.partialorder %v646_v25, 0.0 }
 0x15e   : > { %v967_v29 = vadd.f32 -1.0, %v1062_v27 }
 0x15f   : > { %1063 = vpow2.f32 %v658_v28 }
 0x160   : > { %v667_v30 = vmul.f32 1.6732632, %v967_v29 }
 0x162   : > { %v647_v32 = vpop.f32.mrf.mxu2  ;;  %v671_v33 = vsel %vm651_vm5, %v643_v20, %v667_v30 }
 0x163   : > { %v648_v34 = vadd.f32 %v1049_v15, %v647_v32  ;;  %v675_v36 = vmul.f32 1.050701, %v671_v33 }
 0x165   : > { %v1064_v37 = vpop.eup %1063  ;;  %v660_v38 = vmul.f32 1.442695, %v648_v34  ;;  %v678_v39 = vpack.c.bf16 %v675_v36, %v674_v35  ;;  %vm653_vm7 = vcmp.gt.f32.partialorder %v648_v34, 0.0 }
 0x166   : > { %v968_v40 = vadd.f32 -1.0, %v1064_v37 }
 0x167   : > { %1065 = vpow2.f32 %v660_v38  ;;  %756 = vmatmul.bf16.vlgmr.msra.gmra.mxu3 %v678_v39 }
 0x168   : > { %v668_v41 = vmul.f32 1.6732632, %v968_v40 }
 0x16a   : > { %v672_v45 = vsel %vm652_vm6, %v646_v25, %v668_v41 }
 0x16b   : > { %v676_v47 = vmul.f32 1.050701, %v672_v45 }
 0x16d   : > { %v1066_v42 = vpop.eup %1065 }
 0x16e   : > { %v969_v43 = vadd.f32 -1.0, %v1066_v42 }
 0x170   : > { %v669_v44 = vmul.f32 1.6732632, %v969_v43 }
 0x172   : > { %v673_v46 = vsel %vm653_vm7, %v648_v34, %v669_v44 }
 0x173   : > { %v677_v48 = vmul.f32 1.050701, %v673_v46 }
 0x175   : > { %v679_v49 = vpack.c.bf16 %v677_v48, %v676_v47 }
 0x177   : > { %761 = vmatmul.bf16.gmra.mxu3 %v679_v49 }
 0x1ea   : > { %v757_v51 = vpop.f32.mrf.mxu3 }
 0x1eb   : > { %v758_v52 = vadd.f32 %v1050_v50, %v757_v51 }
 0x1ed   : > { %767 = vst [vmem:[%s329_s30] sm:$0xff] %v758_v52 }
 0x1f2   : > { %v759_v53 = vpop.f32.mrf.mxu3 }
 0x1f3   : > { %v760_v54 = vadd.f32 %v1050_v50, %v759_v53 }
 0x1f5   : > { %768 = vst [vmem:[%s329_s30 + $0x8] sm:$0xff] %v760_v54 }
 0x1fa   : > { %v762_v55 = vpop.f32.mrf.mxu3 }
 0x1fb   : > { %v763_v56 = vadd.f32 %v1050_v50, %v762_v55 }
 0x1fd   : > { %769 = vst [vmem:[%s329_s30 + $0x10] sm:$0xff] %v763_v56 }
 0x202   : > { %v764_v57 = vpop.f32.mrf.mxu3 }
 0x203   : > { %v765_v58 = vadd.f32 %v1050_v50, %v764_v57 }
 0x205   : > { %770 = vst [vmem:[%s329_s30 + $0x18] sm:$0xff] %v765_v58 }
 0x206 PF: > { %s18_s27 = sadd.s32 1, %s1073_s27  }
 0x207   : > { %p15_p4 = scmp.ge.s32.totalorder %s18_s27, 4  }
 0x209   :  { %17 = sbr.rel (!%p15_p4) target bundleno = 1 (0x1), region = 85 }

</bundles_post_ra>
